<compile_context>
chip_gen: v7x
topology: tpu7x:2x2x1
jax: 0.10.0
libtpu: 0.0.40
codegen_flags: <defaults>
</compile_context>

<pallas_src>
import functools

import jax
import jax.numpy as jnp
from jax import lax
from jax.experimental import pallas as pl
from jax.experimental.pallas import tpu as pltpu


# ----------------------------- config --------------------------------------
class Config:
    vocab_size = 64
    hidden_size = 32
    num_hidden_layers = 2
    num_attention_heads = 2
    intermediate_size = 64
    max_position_embeddings = 32
    type_vocab_size = 2
    layer_norm_eps = 1e-12


# --------------------------- in-kernel helpers ------------------------------
def _gelu(x):
    # BERT gelu (tanh approximation, "gelu_new")
    c = 0.7978845608028654  # sqrt(2/pi)
    return 0.5 * x * (1.0 + jnp.tanh(c * (x + 0.044715 * x * x * x)))


def _layer_norm(x, g, b, eps):
    mean = jnp.mean(x, axis=-1, keepdims=True)
    xc = x - mean
    var = jnp.mean(xc * xc, axis=-1, keepdims=True)
    return xc * lax.rsqrt(var + eps) * g + b


# ----------------------------- fused kernel ---------------------------------
def _fused_forward_kernel(
        emb_ref, wqkv_ref, bqkv_ref, wo_ref, wi_ref, bi_ref, wf_ref,
        lvec_ref, gvec_ref, headw_ref, dec_w_ref, dec_b_ref,
        scls_w_ref, scls_b_ref,
        wmp_ref, scls_ref,
        *, num_layers, num_heads, head_dim, batch, seq, eps):
    """Whole batch in one invocation; everything stays in VMEM."""
    H = num_heads * head_dim
    BS = batch * seq
    scale = 1.0 / float(head_dim) ** 0.5

    # (B, S, H) -> (B*S, H): pure sublane merge (S is a multiple of 8), no-op.
    x = emb_ref[...].astype(jnp.float32).reshape(BS, H)

    # Embedding LayerNorm (gvec rows: 0=g, 1=b).
    h = _layer_norm(x, gvec_ref[0:1, :], gvec_ref[1:2, :], eps)

    for l in range(num_layers):                                   # static unroll
        # ---- self-attention: head / qkv split on leading *ref* axes ----
        attn = None
        for hd in range(num_heads):
            q = (jnp.dot(h, wqkv_ref[l, 0, hd],
                         preferred_element_type=jnp.float32)
                 + bqkv_ref[l, 0, hd])                            # (BS, dh)
            k = (jnp.dot(h, wqkv_ref[l, 1, hd],
                         preferred_element_type=jnp.float32)
                 + bqkv_ref[l, 1, hd])
            v = (jnp.dot(h, wqkv_ref[l, 2, hd],
                         preferred_element_type=jnp.float32)
                 + bqkv_ref[l, 2, hd])
            q3 = q.reshape(batch, seq, head_dim)                  # sublane split
            k3 = k.reshape(batch, seq, head_dim)
            v3 = v.reshape(batch, seq, head_dim)
            s = jnp.einsum('bqd,bkd->bqk', q3, k3,
                           preferred_element_type=jnp.float32) * scale
            m = jnp.max(s, axis=-1, keepdims=True)
            e = jnp.exp(s - m)
            p = e * pl.reciprocal(jnp.sum(e, axis=-1, keepdims=True),
                                  approx=True)
            ctx = jnp.einsum('bqk,bkd->bqd', p, v3,
                             preferred_element_type=jnp.float32)  # (B, S, dh)
            # concat-of-heads @ Wo == sum_h ctx_h @ Wo[h]
            contrib = jnp.dot(ctx.reshape(BS, head_dim), wo_ref[l, hd],
                              preferred_element_type=jnp.float32)
            attn = contrib if attn is None else attn + contrib
        attn = attn + lvec_ref[l, 0:1, :]                         # bo
        h = _layer_norm(attn + h, lvec_ref[l, 1:2, :], lvec_ref[l, 2:3, :], eps)

        # ---- feed-forward ----
        inter = _gelu(jnp.dot(h, wi_ref[l],
                              preferred_element_type=jnp.float32) + bi_ref[l])
        ffn = (jnp.dot(inter, wf_ref[l], preferred_element_type=jnp.float32)
               + lvec_ref[l, 3:4, :])                             # bf
        h = _layer_norm(ffn + h, lvec_ref[l, 4:5, :], lvec_ref[l, 5:6, :], eps)

    # ---- pooler + sentence-classification head (CLS token, row b*S) ----
    cls = jnp.concatenate(
        [h[b * seq:b * seq + 1, :] for b in range(batch)], axis=0)  # (B, H)
    pooled = jnp.tanh(
        jnp.dot(cls, headw_ref[0], preferred_element_type=jnp.float32)
        + gvec_ref[2:3, :])                                       # pool_b
    scls = (jnp.dot(pooled, scls_w_ref[...],
                    preferred_element_type=jnp.float32) + scls_b_ref[...])
    scls_ref[...] = scls.astype(scls_ref.dtype)

    # ---- masked-LM head: dense + gelu + LN + tied decoder (word_emb^T) ----
    t = _gelu(jnp.dot(h, headw_ref[1], preferred_element_type=jnp.float32)
              + gvec_ref[3:4, :])                                 # lm_tr_b
    t = _layer_norm(t, gvec_ref[4:5, :], gvec_ref[5:6, :], eps)
    logits = lax.dot_general(t, dec_w_ref[...], (((1,), (1,)), ((), ())),
                             preferred_element_type=jnp.float32) + dec_b_ref[...]
    # (BS, Vp) -> (B, S, Vp): lane-dense (Vp = multiple of 128) unmasked store.
    wmp_ref[...] = logits.reshape(batch, seq, -1).astype(wmp_ref.dtype)


def _estimate_cost(B, S, H, I, L, nh, dh, Vp):
    bs = B * S
    per_layer = (2 * bs * H * dh * 3 * nh            # q, k, v projections
                 + nh * (2 * B * S * S * dh) * 2     # scores + context
                 + nh * 2 * bs * dh * H              # output projection
                 + 2 * bs * H * I + 2 * bs * I * H)  # feed-forward
    head = 2 * bs * H * H + 2 * bs * H * Vp + 2 * B * H * H + 2 * B * H * 2
    flops = L * per_layer + head
    transcendentals = (L * (nh * B * S * S + bs * I)  # softmax exp + gelu tanh
                       + bs * H + B * H)              # lm gelu + pooler tanh
    return int(flops), int(transcendentals)


def fused_forward(cfg, params, emb):
    """emb: (B, S, H) f32 -> (wmp (B,S,V), sclsp (B,2))."""
    B, S, H = emb.shape
    V = cfg.vocab_size
    L = cfg.num_hidden_layers
    I = cfg.intermediate_size
    nh = cfg.num_attention_heads
    dh = H // nh
    Vp = max(128, ((V + 127) // 128) * 128)           # lane-dense logits width

    # Tied decoder padded to Vp output lanes (zeros sliced off in the wrapper).
    dec_w = jnp.pad(params["word_emb"], ((0, Vp - V), (0, 0)))
    dec_b = jnp.pad(params["lm_dec_b"], ((0, 0), (0, Vp - V)))

    kernel = functools.partial(
        _fused_forward_kernel, num_layers=L, num_heads=nh, head_dim=dh,
        batch=B, seq=S, eps=cfg.layer_norm_eps)

    args = (emb, params["wqkv"], params["bqkv"], params["wo"],
            params["wi"], params["bi"], params["wf"],
            params["lvec"], params["gvec"], params["head_w"],
            dec_w, dec_b, params["scls_w"], params["scls_b"])

    out_shape = [jax.ShapeDtypeStruct((B, S, Vp), jnp.float32),
                 jax.ShapeDtypeStruct((B, 2), jnp.float32)]

    in_bytes = sum(int(a.size) * a.dtype.itemsize for a in args)
    out_bytes = B * S * Vp * 4 + B * 2 * 4
    flops, transcendentals = _estimate_cost(B, S, H, I, L, nh, dh, Vp)

    wmp_full, scls = pl.pallas_call(
        kernel,
        in_specs=[pl.BlockSpec(memory_space=pltpu.MemorySpace.VMEM)
                  for _ in range(len(args))],
        out_specs=[pl.BlockSpec(memory_space=pltpu.MemorySpace.VMEM)
                   for _ in range(2)],
        out_shape=out_shape,
        compiler_params=pltpu.CompilerParams(
            vmem_limit_bytes=32 * 1024 * 1024),
        cost_estimate=pl.CostEstimate(
            flops=flops, transcendentals=transcendentals,
            bytes_accessed=in_bytes + out_bytes),
    )(*args)
    return wmp_full[:, :, :V], scls


# --------------------------- parameter init --------------------------------
def init_params(cfg, key):
    keys = iter(jax.random.split(key, 16))

    def nrm(shape):
        return 0.02 * jax.random.normal(next(keys), shape, jnp.float32)

    H, I, V = cfg.hidden_size, cfg.intermediate_size, cfg.vocab_size
    L, nh = cfg.num_hidden_layers, cfg.num_attention_heads
    dh = H // nh

    # q/k/v fused with head and q-k-v on leading axes: (L, 3, nh, H, dh).
    wq, wk, wv = nrm((L, H, H)), nrm((L, H, H)), nrm((L, H, H))
    wqkv = (jnp.stack([wq, wk, wv], axis=1)
            .reshape(L, 3, H, nh, dh)
            .transpose(0, 1, 3, 2, 4))                       # (L, 3, nh, H, dh)
    wo = nrm((L, H, H)).reshape(L, nh, dh, H)                # (L, nh, dh, H)

    # Per-layer H-width vectors packed: [bo, ln1_g, ln1_b, bf, ln2_g, ln2_b].
    lvec = jnp.stack([jnp.zeros((L, H)), jnp.ones((L, H)), jnp.zeros((L, H)),
                      jnp.zeros((L, H)), jnp.ones((L, H)), jnp.zeros((L, H))],
                     axis=1).astype(jnp.float32)             # (L, 6, H)
    # Global H-width vectors packed:
    # [emb_ln_g, emb_ln_b, pool_b, lm_tr_b, lm_ln_g, lm_ln_b].
    gvec = jnp.stack([jnp.ones((H,)), jnp.zeros((H,)), jnp.zeros((H,)),
                      jnp.zeros((H,)), jnp.ones((H,)), jnp.zeros((H,))],
                     axis=0).astype(jnp.float32)             # (6, H)

    return dict(
        word_emb=nrm((V, H)),
        pos_emb=nrm((cfg.max_position_embeddings, H)),
        type_emb=nrm((cfg.type_vocab_size, H)),
        wqkv=wqkv,
        bqkv=jnp.zeros((L, 3, nh, 1, dh), jnp.float32),
        wo=wo,
        wi=nrm((L, H, I)), bi=jnp.zeros((L, 1, I), jnp.float32),
        wf=nrm((L, I, H)),
        lvec=lvec, gvec=gvec,
        head_w=jnp.stack([nrm((H, H)), nrm((H, H))], axis=0),  # pool_w, lm_tr_w
        lm_dec_b=jnp.zeros((1, V), jnp.float32),
        scls_w=nrm((H, 2)), scls_b=jnp.zeros((1, 2), jnp.float32),
    )


# ----------------------------- model forward --------------------------------
def cross_entropy_ignore(logits, labels, ignore_index=-1):
    # CrossEntropyLoss(ignore_index=-1): mean NLL over non-ignored positions.
    valid = labels != ignore_index
    safe = jnp.where(valid, labels, 0)
    logp = jax.nn.log_softmax(logits.astype(jnp.float32), axis=-1)
    nll = -jnp.take_along_axis(logp, safe[:, None], axis=-1)[:, 0]
    nll = jnp.where(valid, nll, 0.0)
    cnt = jnp.maximum(jnp.sum(valid.astype(jnp.float32)), 1.0)
    return jnp.sum(nll) / cnt


def pretrain_forward(cfg, params, input_ids, token_type_ids=None,
                     masked_lm_labels=None, next_sentence_labels=None):
    if token_type_ids is None:
        token_type_ids = jnp.zeros_like(input_ids)
    B, S = input_ids.shape

    # Embedding lookups are data-dependent gathers — glue in plain JAX.
    # TODO(synk): no attention_mask path (mirrors the reference forward signature).
    emb = (params["word_emb"][input_ids]
           + params["pos_emb"][:S][None, :, :]
           + params["type_emb"][token_type_ids])

    wmp, sclsp = fused_forward(cfg, params, emb)

    if masked_lm_labels is not None and next_sentence_labels is not None:
        loss1 = cross_entropy_ignore(wmp.reshape(-1, cfg.vocab_size),
                                     masked_lm_labels.reshape(-1))
        loss2 = cross_entropy_ignore(sclsp.reshape(-1, 2),
                                     next_sentence_labels.reshape(-1))
        return loss1 + loss2
    return wmp, sclsp


# --------------------------------- main -------------------------------------
if __name__ == "__main__":
    cfg = Config()
    key = jax.random.PRNGKey(0)
    pk, ik, tk, mk, nk = jax.random.split(key, 5)
    params = init_params(cfg, pk)

    B, S = 2, 8
    input_ids = jax.random.randint(ik, (B, S), 0, cfg.vocab_size)
    token_type_ids = jax.random.randint(tk, (B, S), 0, cfg.type_vocab_size)
    masked_lm_labels = jax.random.randint(mk, (B, S), -1, cfg.vocab_size)
    next_sentence_labels = jax.random.randint(nk, (B,), 0, 2)

    logits_fn = jax.jit(lambda prm, ids, tt: pretrain_forward(cfg, prm, ids, tt))
    loss_fn = jax.jit(lambda prm, ids, tt, ml, ns: pretrain_forward(
        cfg, prm, ids, tt, ml, ns))

    # logits path
    wmp, sclsp = logits_fn(params, input_ids, token_type_ids)
    # loss path (masked_lm_labels use -1 as ignore_index)
    loss = loss_fn(params, input_ids, token_type_ids,
                   masked_lm_labels, next_sentence_labels)

    jax.block_until_ready((wmp, sclsp, loss))
    assert wmp.shape == (B, S, cfg.vocab_size)
    assert sclsp.shape == (B, 2)
    assert loss.shape == ()
    print("KERNEL_OK")
</pallas_src>

<mosaic_0001>
module attributes {stable_mosaic.version = 11 : i64} {
  func.func @_fused_forward_kernel(%arg0: memref<2x8x32xf32, #tpu.memory_space<vmem>>, %arg1: memref<2x3x2x32x16xf32, #tpu.memory_space<vmem>>, %arg2: memref<2x3x2x1x16xf32, #tpu.memory_space<vmem>>, %arg3: memref<2x2x16x32xf32, #tpu.memory_space<vmem>>, %arg4: memref<2x32x64xf32, #tpu.memory_space<vmem>>, %arg5: memref<2x1x64xf32, #tpu.memory_space<vmem>>, %arg6: memref<2x64x32xf32, #tpu.memory_space<vmem>>, %arg7: memref<2x6x32xf32, #tpu.memory_space<vmem>>, %arg8: memref<6x32xf32, #tpu.memory_space<vmem>>, %arg9: memref<2x32x32xf32, #tpu.memory_space<vmem>>, %arg10: memref<128x32xf32, #tpu.memory_space<vmem>>, %arg11: memref<1x128xf32, #tpu.memory_space<vmem>>, %arg12: memref<32x2xf32, #tpu.memory_space<vmem>>, %arg13: memref<1x2xf32, #tpu.memory_space<vmem>>, %arg14: memref<2x8x128xf32, #tpu.memory_space<vmem>>, %arg15: memref<2x2xf32, #tpu.memory_space<vmem>>) attributes {dimension_semantics = [], scalar_prefetch = 0 : i64, scratch_operands = 0 : i64, tpu.core_type = #tpu.core_type<tc>} {
    %c0 = arith.constant 0 : index
    %c0_0 = arith.constant 0 : index
    %c0_1 = arith.constant 0 : index
    %0 = vector.load %arg0[%c0, %c0_0, %c0_1] : memref<2x8x32xf32, #tpu.memory_space<vmem>>, vector<2x8x32xf32>
    %1 = vector.shape_cast %0 : vector<2x8x32xf32> to vector<16x32xf32>
    %c0_2 = arith.constant 0 : index
    %c0_3 = arith.constant 0 : index
    %2 = vector.load %arg8[%c0_2, %c0_3] : memref<6x32xf32, #tpu.memory_space<vmem>>, vector<1x32xf32>
    %c1 = arith.constant 1 : index
    %c0_4 = arith.constant 0 : index
    %3 = vector.load %arg8[%c1, %c0_4] : memref<6x32xf32, #tpu.memory_space<vmem>>, vector<1x32xf32>
    %cst = arith.constant dense<0.000000e+00> : vector<16xf32>
    %4 = vector.multi_reduction <add>, %1, %cst [1] : vector<16x32xf32> to vector<16xf32>
    %5 = vector.shape_cast %4 : vector<16xf32> to vector<16x1xf32>
    %cst_5 = arith.constant 3.200000e+01 : f32
    %6 = vector.broadcast %cst_5 : f32 to vector<16x1xf32>
    %7 = arith.divf %5, %6 : vector<16x1xf32>
    %8 = vector.broadcast %7 : vector<16x1xf32> to vector<16x32xf32>
    %9 = arith.subf %1, %8 : vector<16x32xf32>
    %10 = arith.mulf %9, %9 : vector<16x32xf32>
    %cst_6 = arith.constant dense<0.000000e+00> : vector<16xf32>
    %11 = vector.multi_reduction <add>, %10, %cst_6 [1] : vector<16x32xf32> to vector<16xf32>
    %12 = vector.shape_cast %11 : vector<16xf32> to vector<16x1xf32>
    %cst_7 = arith.constant 3.200000e+01 : f32
    %13 = vector.broadcast %cst_7 : f32 to vector<16x1xf32>
    %14 = arith.divf %12, %13 : vector<16x1xf32>
    %cst_8 = arith.constant 9.99999996E-13 : f32
    %15 = vector.broadcast %cst_8 : f32 to vector<16x1xf32>
    %16 = arith.addf %14, %15 : vector<16x1xf32>
    %17 = math.rsqrt %16 : vector<16x1xf32>
    %18 = vector.broadcast %17 : vector<16x1xf32> to vector<16x32xf32>
    %19 = arith.mulf %9, %18 : vector<16x32xf32>
    %20 = vector.broadcast %2 : vector<1x32xf32> to vector<16x32xf32>
    %21 = arith.mulf %19, %20 : vector<16x32xf32>
    %22 = vector.broadcast %3 : vector<1x32xf32> to vector<16x32xf32>
    %23 = arith.addf %21, %22 : vector<16x32xf32>
    %c0_9 = arith.constant 0 : index
    %c0_10 = arith.constant 0 : index
    %c0_11 = arith.constant 0 : index
    %c0_12 = arith.constant 0 : index
    %c0_13 = arith.constant 0 : index
    %24 = vector.load %arg1[%c0_9, %c0_10, %c0_11, %c0_12, %c0_13] : memref<2x3x2x32x16xf32, #tpu.memory_space<vmem>>, vector<1x1x1x32x16xf32>
    %25 = vector.shape_cast %24 : vector<1x1x1x32x16xf32> to vector<32x16xf32>
    %cst_14 = arith.constant dense<0.000000e+00> : vector<16x16xf32>
    %26 = tpu.matmul %23, %25, %cst_14 {dimension_numbers = #tpu.dot_dimension_numbers<[1], [0], [0], [1], [0, 0, 1, 1], [], []>} : vector<16x32xf32>, vector<32x16xf32>, vector<16x16xf32> -> vector<16x16xf32>
    %c0_15 = arith.constant 0 : index
    %c0_16 = arith.constant 0 : index
    %c0_17 = arith.constant 0 : index
    %c0_18 = arith.constant 0 : index
    %c0_19 = arith.constant 0 : index
    %27 = vector.load %arg2[%c0_15, %c0_16, %c0_17, %c0_18, %c0_19] : memref<2x3x2x1x16xf32, #tpu.memory_space<vmem>>, vector<1x1x1x1x16xf32>
    %28 = vector.shape_cast %27 : vector<1x1x1x1x16xf32> to vector<1x16xf32>
    %29 = vector.broadcast %28 : vector<1x16xf32> to vector<16x16xf32>
    %30 = arith.addf %26, %29 : vector<16x16xf32>
    %c0_20 = arith.constant 0 : index
    %c1_21 = arith.constant 1 : index
    %c0_22 = arith.constant 0 : index
    %c0_23 = arith.constant 0 : index
    %c0_24 = arith.constant 0 : index
    %31 = vector.load %arg1[%c0_20, %c1_21, %c0_22, %c0_23, %c0_24] : memref<2x3x2x32x16xf32, #tpu.memory_space<vmem>>, vector<1x1x1x32x16xf32>
    %32 = vector.shape_cast %31 : vector<1x1x1x32x16xf32> to vector<32x16xf32>
    %cst_25 = arith.constant dense<0.000000e+00> : vector<16x16xf32>
    %33 = tpu.matmul %23, %32, %cst_25 {dimension_numbers = #tpu.dot_dimension_numbers<[1], [0], [0], [1], [0, 0, 1, 1], [], []>} : vector<16x32xf32>, vector<32x16xf32>, vector<16x16xf32> -> vector<16x16xf32>
    %c0_26 = arith.constant 0 : index
    %c1_27 = arith.constant 1 : index
    %c0_28 = arith.constant 0 : index
    %c0_29 = arith.constant 0 : index
    %c0_30 = arith.constant 0 : index
    %34 = vector.load %arg2[%c0_26, %c1_27, %c0_28, %c0_29, %c0_30] : memref<2x3x2x1x16xf32, #tpu.memory_space<vmem>>, vector<1x1x1x1x16xf32>
    %35 = vector.shape_cast %34 : vector<1x1x1x1x16xf32> to vector<1x16xf32>
    %36 = vector.broadcast %35 : vector<1x16xf32> to vector<16x16xf32>
    %37 = arith.addf %33, %36 : vector<16x16xf32>
    %c0_31 = arith.constant 0 : index
    %c2 = arith.constant 2 : index
    %c0_32 = arith.constant 0 : index
    %c0_33 = arith.constant 0 : index
    %c0_34 = arith.constant 0 : index
    %38 = vector.load %arg1[%c0_31, %c2, %c0_32, %c0_33, %c0_34] : memref<2x3x2x32x16xf32, #tpu.memory_space<vmem>>, vector<1x1x1x32x16xf32>
    %39 = vector.shape_cast %38 : vector<1x1x1x32x16xf32> to vector<32x16xf32>
    %cst_35 = arith.constant dense<0.000000e+00> : vector<16x16xf32>
    %40 = tpu.matmul %23, %39, %cst_35 {dimension_numbers = #tpu.dot_dimension_numbers<[1], [0], [0], [1], [0, 0, 1, 1], [], []>} : vector<16x32xf32>, vector<32x16xf32>, vector<16x16xf32> -> vector<16x16xf32>
    %c0_36 = arith.constant 0 : index
    %c2_37 = arith.constant 2 : index
    %c0_38 = arith.constant 0 : index
    %c0_39 = arith.constant 0 : index
    %c0_40 = arith.constant 0 : index
    %41 = vector.load %arg2[%c0_36, %c2_37, %c0_38, %c0_39, %c0_40] : memref<2x3x2x1x16xf32, #tpu.memory_space<vmem>>, vector<1x1x1x1x16xf32>
    %42 = vector.shape_cast %41 : vector<1x1x1x1x16xf32> to vector<1x16xf32>
    %43 = vector.broadcast %42 : vector<1x16xf32> to vector<16x16xf32>
    %44 = arith.addf %40, %43 : vector<16x16xf32>
    %45 = vector.shape_cast %30 : vector<16x16xf32> to vector<2x8x16xf32>
    %46 = vector.shape_cast %37 : vector<16x16xf32> to vector<2x8x16xf32>
    %47 = vector.shape_cast %44 : vector<16x16xf32> to vector<2x8x16xf32>
    "tpu.trace_start"() <{level = 10 : i32, message = "bqd,bkd->bqk"}> : () -> ()
    %cst_41 = arith.constant dense<0.000000e+00> : vector<2x8x8xf32>
    %48 = tpu.matmul %45, %46, %cst_41 {dimension_numbers = #tpu.dot_dimension_numbers<[2], [2], [1], [1], [0, 0, 0, 1, 1, 1], [0], [0]>} : vector<2x8x16xf32>, vector<2x8x16xf32>, vector<2x8x8xf32> -> vector<2x8x8xf32>
    "tpu.trace_stop"() : () -> ()
    %cst_42 = arith.constant 2.500000e-01 : f32
    %49 = vector.broadcast %cst_42 : f32 to vector<2x8x8xf32>
    %50 = arith.mulf %48, %49 : vector<2x8x8xf32>
    %cst_43 = arith.constant dense<0xFF800000> : vector<2x8xf32>
    %51 = vector.multi_reduction <maximumf>, %50, %cst_43 [2] : vector<2x8x8xf32> to vector<2x8xf32>
    %52 = vector.shape_cast %51 : vector<2x8xf32> to vector<2x8x1xf32>
    %53 = vector.broadcast %52 : vector<2x8x1xf32> to vector<2x8x8xf32>
    %54 = arith.subf %50, %53 : vector<2x8x8xf32>
    %55 = math.exp %54 : vector<2x8x8xf32>
    %cst_44 = arith.constant dense<0.000000e+00> : vector<2x8xf32>
    %56 = vector.multi_reduction <add>, %55, %cst_44 [2] : vector<2x8x8xf32> to vector<2x8xf32>
    %57 = vector.shape_cast %56 : vector<2x8xf32> to vector<2x8x1xf32>
    %58 = tpu.reciprocal %57 {approx = true} : vector<2x8x1xf32> -> vector<2x8x1xf32>
    %59 = vector.broadcast %58 : vector<2x8x1xf32> to vector<2x8x8xf32>
    %60 = arith.mulf %55, %59 : vector<2x8x8xf32>
    "tpu.trace_start"() <{level = 10 : i32, message = "bqk,bkd->bqd"}> : () -> ()
    %cst_45 = arith.constant dense<0.000000e+00> : vector<2x8x16xf32>
    %61 = tpu.matmul %60, %47, %cst_45 {dimension_numbers = #tpu.dot_dimension_numbers<[2], [1], [1], [2], [0, 0, 0, 1, 1, 2], [0], [0]>} : vector<2x8x8xf32>, vector<2x8x16xf32>, vector<2x8x16xf32> -> vector<2x8x16xf32>
    "tpu.trace_stop"() : () -> ()
    %62 = vector.shape_cast %61 : vector<2x8x16xf32> to vector<16x16xf32>
    %c0_46 = arith.constant 0 : index
    %c0_47 = arith.constant 0 : index
    %c0_48 = arith.constant 0 : index
    %c0_49 = arith.constant 0 : index
    %63 = vector.load %arg3[%c0_46, %c0_47, %c0_48, %c0_49] : memref<2x2x16x32xf32, #tpu.memory_space<vmem>>, vector<1x1x16x32xf32>
    %64 = vector.shape_cast %63 : vector<1x1x16x32xf32> to vector<16x32xf32>
    %cst_50 = arith.constant dense<0.000000e+00> : vector<16x32xf32>
    %65 = tpu.matmul %62, %64, %cst_50 {dimension_numbers = #tpu.dot_dimension_numbers<[1], [0], [0], [1], [0, 0, 1, 1], [], []>} : vector<16x16xf32>, vector<16x32xf32>, vector<16x32xf32> -> vector<16x32xf32>
    %c0_51 = arith.constant 0 : index
    %c0_52 = arith.constant 0 : index
    %c1_53 = arith.constant 1 : index
    %c0_54 = arith.constant 0 : index
    %c0_55 = arith.constant 0 : index
    %66 = vector.load %arg1[%c0_51, %c0_52, %c1_53, %c0_54, %c0_55] : memref<2x3x2x32x16xf32, #tpu.memory_space<vmem>>, vector<1x1x1x32x16xf32>
    %67 = vector.shape_cast %66 : vector<1x1x1x32x16xf32> to vector<32x16xf32>
    %cst_56 = arith.constant dense<0.000000e+00> : vector<16x16xf32>
    %68 = tpu.matmul %23, %67, %cst_56 {dimension_numbers = #tpu.dot_dimension_numbers<[1], [0], [0], [1], [0, 0, 1, 1], [], []>} : vector<16x32xf32>, vector<32x16xf32>, vector<16x16xf32> -> vector<16x16xf32>
    %c0_57 = arith.constant 0 : index
    %c0_58 = arith.constant 0 : index
    %c1_59 = arith.constant 1 : index
    %c0_60 = arith.constant 0 : index
    %c0_61 = arith.constant 0 : index
    %69 = vector.load %arg2[%c0_57, %c0_58, %c1_59, %c0_60, %c0_61] : memref<2x3x2x1x16xf32, #tpu.memory_space<vmem>>, vector<1x1x1x1x16xf32>
    %70 = vector.shape_cast %69 : vector<1x1x1x1x16xf32> to vector<1x16xf32>
    %71 = vector.broadcast %70 : vector<1x16xf32> to vector<16x16xf32>
    %72 = arith.addf %68, %71 : vector<16x16xf32>
    %c0_62 = arith.constant 0 : index
    %c1_63 = arith.constant 1 : index
    %c1_64 = arith.constant 1 : index
    %c0_65 = arith.constant 0 : index
    %c0_66 = arith.constant 0 : index
    %73 = vector.load %arg1[%c0_62, %c1_63, %c1_64, %c0_65, %c0_66] : memref<2x3x2x32x16xf32, #tpu.memory_space<vmem>>, vector<1x1x1x32x16xf32>
    %74 = vector.shape_cast %73 : vector<1x1x1x32x16xf32> to vector<32x16xf32>
    %cst_67 = arith.constant dense<0.000000e+00> : vector<16x16xf32>
    %75 = tpu.matmul %23, %74, %cst_67 {dimension_numbers = #tpu.dot_dimension_numbers<[1], [0], [0], [1], [0, 0, 1, 1], [], []>} : vector<16x32xf32>, vector<32x16xf32>, vector<16x16xf32> -> vector<16x16xf32>
    %c0_68 = arith.constant 0 : index
    %c1_69 = arith.constant 1 : index
    %c1_70 = arith.constant 1 : index
    %c0_71 = arith.constant 0 : index
    %c0_72 = arith.constant 0 : index
    %76 = vector.load %arg2[%c0_68, %c1_69, %c1_70, %c0_71, %c0_72] : memref<2x3x2x1x16xf32, #tpu.memory_space<vmem>>, vector<1x1x1x1x16xf32>
    %77 = vector.shape_cast %76 : vector<1x1x1x1x16xf32> to vector<1x16xf32>
    %78 = vector.broadcast %77 : vector<1x16xf32> to vector<16x16xf32>
    %79 = arith.addf %75, %78 : vector<16x16xf32>
    %c0_73 = arith.constant 0 : index
    %c2_74 = arith.constant 2 : index
    %c1_75 = arith.constant 1 : index
    %c0_76 = arith.constant 0 : index
    %c0_77 = arith.constant 0 : index
    %80 = vector.load %arg1[%c0_73, %c2_74, %c1_75, %c0_76, %c0_77] : memref<2x3x2x32x16xf32, #tpu.memory_space<vmem>>, vector<1x1x1x32x16xf32>
    %81 = vector.shape_cast %80 : vector<1x1x1x32x16xf32> to vector<32x16xf32>
    %cst_78 = arith.constant dense<0.000000e+00> : vector<16x16xf32>
    %82 = tpu.matmul %23, %81, %cst_78 {dimension_numbers = #tpu.dot_dimension_numbers<[1], [0], [0], [1], [0, 0, 1, 1], [], []>} : vector<16x32xf32>, vector<32x16xf32>, vector<16x16xf32> -> vector<16x16xf32>
    %c0_79 = arith.constant 0 : index
    %c2_80 = arith.constant 2 : index
    %c1_81 = arith.constant 1 : index
    %c0_82 = arith.constant 0 : index
    %c0_83 = arith.constant 0 : index
    %83 = vector.load %arg2[%c0_79, %c2_80, %c1_81, %c0_82, %c0_83] : memref<2x3x2x1x16xf32, #tpu.memory_space<vmem>>, vector<1x1x1x1x16xf32>
    %84 = vector.shape_cast %83 : vector<1x1x1x1x16xf32> to vector<1x16xf32>
    %85 = vector.broadcast %84 : vector<1x16xf32> to vector<16x16xf32>
    %86 = arith.addf %82, %85 : vector<16x16xf32>
    %87 = vector.shape_cast %72 : vector<16x16xf32> to vector<2x8x16xf32>
    %88 = vector.shape_cast %79 : vector<16x16xf32> to vector<2x8x16xf32>
    %89 = vector.shape_cast %86 : vector<16x16xf32> to vector<2x8x16xf32>
    "tpu.trace_start"() <{level = 10 : i32, message = "bqd,bkd->bqk"}> : () -> ()
    %cst_84 = arith.constant dense<0.000000e+00> : vector<2x8x8xf32>
    %90 = tpu.matmul %87, %88, %cst_84 {dimension_numbers = #tpu.dot_dimension_numbers<[2], [2], [1], [1], [0, 0, 0, 1, 1, 1], [0], [0]>} : vector<2x8x16xf32>, vector<2x8x16xf32>, vector<2x8x8xf32> -> vector<2x8x8xf32>
    "tpu.trace_stop"() : () -> ()
    %cst_85 = arith.constant 2.500000e-01 : f32
    %91 = vector.broadcast %cst_85 : f32 to vector<2x8x8xf32>
    %92 = arith.mulf %90, %91 : vector<2x8x8xf32>
    %cst_86 = arith.constant dense<0xFF800000> : vector<2x8xf32>
    %93 = vector.multi_reduction <maximumf>, %92, %cst_86 [2] : vector<2x8x8xf32> to vector<2x8xf32>
    %94 = vector.shape_cast %93 : vector<2x8xf32> to vector<2x8x1xf32>
    %95 = vector.broadcast %94 : vector<2x8x1xf32> to vector<2x8x8xf32>
    %96 = arith.subf %92, %95 : vector<2x8x8xf32>
    %97 = math.exp %96 : vector<2x8x8xf32>
    %cst_87 = arith.constant dense<0.000000e+00> : vector<2x8xf32>
    %98 = vector.multi_reduction <add>, %97, %cst_87 [2] : vector<2x8x8xf32> to vector<2x8xf32>
    %99 = vector.shape_cast %98 : vector<2x8xf32> to vector<2x8x1xf32>
    %100 = tpu.reciprocal %99 {approx = true} : vector<2x8x1xf32> -> vector<2x8x1xf32>
    %101 = vector.broadcast %100 : vector<2x8x1xf32> to vector<2x8x8xf32>
    %102 = arith.mulf %97, %101 : vector<2x8x8xf32>
    "tpu.trace_start"() <{level = 10 : i32, message = "bqk,bkd->bqd"}> : () -> ()
    %cst_88 = arith.constant dense<0.000000e+00> : vector<2x8x16xf32>
    %103 = tpu.matmul %102, %89, %cst_88 {dimension_numbers = #tpu.dot_dimension_numbers<[2], [1], [1], [2], [0, 0, 0, 1, 1, 2], [0], [0]>} : vector<2x8x8xf32>, vector<2x8x16xf32>, vector<2x8x16xf32> -> vector<2x8x16xf32>
    "tpu.trace_stop"() : () -> ()
    %104 = vector.shape_cast %103 : vector<2x8x16xf32> to vector<16x16xf32>
    %c0_89 = arith.constant 0 : index
    %c1_90 = arith.constant 1 : index
    %c0_91 = arith.constant 0 : index
    %c0_92 = arith.constant 0 : index
    %105 = vector.load %arg3[%c0_89, %c1_90, %c0_91, %c0_92] : memref<2x2x16x32xf32, #tpu.memory_space<vmem>>, vector<1x1x16x32xf32>
    %106 = vector.shape_cast %105 : vector<1x1x16x32xf32> to vector<16x32xf32>
    %cst_93 = arith.constant dense<0.000000e+00> : vector<16x32xf32>
    %107 = tpu.matmul %104, %106, %cst_93 {dimension_numbers = #tpu.dot_dimension_numbers<[1], [0], [0], [1], [0, 0, 1, 1], [], []>} : vector<16x16xf32>, vector<16x32xf32>, vector<16x32xf32> -> vector<16x32xf32>
    %108 = arith.addf %65, %107 : vector<16x32xf32>
    %c0_94 = arith.constant 0 : index
    %c0_95 = arith.constant 0 : index
    %c0_96 = arith.constant 0 : index
    %109 = vector.load %arg7[%c0_94, %c0_95, %c0_96] : memref<2x6x32xf32, #tpu.memory_space<vmem>>, vector<1x1x32xf32>
    %110 = vector.shape_cast %109 : vector<1x1x32xf32> to vector<1x32xf32>
    %111 = vector.broadcast %110 : vector<1x32xf32> to vector<16x32xf32>
    %112 = arith.addf %108, %111 : vector<16x32xf32>
    %113 = arith.addf %112, %23 : vector<16x32xf32>
    %c0_97 = arith.constant 0 : index
    %c1_98 = arith.constant 1 : index
    %c0_99 = arith.constant 0 : index
    %114 = vector.load %arg7[%c0_97, %c1_98, %c0_99] : memref<2x6x32xf32, #tpu.memory_space<vmem>>, vector<1x1x32xf32>
    %115 = vector.shape_cast %114 : vector<1x1x32xf32> to vector<1x32xf32>
    %c0_100 = arith.constant 0 : index
    %c2_101 = arith.constant 2 : index
    %c0_102 = arith.constant 0 : index
    %116 = vector.load %arg7[%c0_100, %c2_101, %c0_102] : memref<2x6x32xf32, #tpu.memory_space<vmem>>, vector<1x1x32xf32>
    %117 = vector.shape_cast %116 : vector<1x1x32xf32> to vector<1x32xf32>
    %cst_103 = arith.constant dense<0.000000e+00> : vector<16xf32>
    %118 = vector.multi_reduction <add>, %113, %cst_103 [1] : vector<16x32xf32> to vector<16xf32>
    %119 = vector.shape_cast %118 : vector<16xf32> to vector<16x1xf32>
    %cst_104 = arith.constant 3.200000e+01 : f32
    %120 = vector.broadcast %cst_104 : f32 to vector<16x1xf32>
    %121 = arith.divf %119, %120 : vector<16x1xf32>
    %122 = vector.broadcast %121 : vector<16x1xf32> to vector<16x32xf32>
    %123 = arith.subf %113, %122 : vector<16x32xf32>
    %124 = arith.mulf %123, %123 : vector<16x32xf32>
    %cst_105 = arith.constant dense<0.000000e+00> : vector<16xf32>
    %125 = vector.multi_reduction <add>, %124, %cst_105 [1] : vector<16x32xf32> to vector<16xf32>
    %126 = vector.shape_cast %125 : vector<16xf32> to vector<16x1xf32>
    %cst_106 = arith.constant 3.200000e+01 : f32
    %127 = vector.broadcast %cst_106 : f32 to vector<16x1xf32>
    %128 = arith.divf %126, %127 : vector<16x1xf32>
    %cst_107 = arith.constant 9.99999996E-13 : f32
    %129 = vector.broadcast %cst_107 : f32 to vector<16x1xf32>
    %130 = arith.addf %128, %129 : vector<16x1xf32>
    %131 = math.rsqrt %130 : vector<16x1xf32>
    %132 = vector.broadcast %131 : vector<16x1xf32> to vector<16x32xf32>
    %133 = arith.mulf %123, %132 : vector<16x32xf32>
    %134 = vector.broadcast %115 : vector<1x32xf32> to vector<16x32xf32>
    %135 = arith.mulf %133, %134 : vector<16x32xf32>
    %136 = vector.broadcast %117 : vector<1x32xf32> to vector<16x32xf32>
    %137 = arith.addf %135, %136 : vector<16x32xf32>
    %c0_108 = arith.constant 0 : index
    %c0_109 = arith.constant 0 : index
    %c0_110 = arith.constant 0 : index
    %138 = vector.load %arg4[%c0_108, %c0_109, %c0_110] : memref<2x32x64xf32, #tpu.memory_space<vmem>>, vector<1x32x64xf32>
    %139 = vector.shape_cast %138 : vector<1x32x64xf32> to vector<32x64xf32>
    %cst_111 = arith.constant dense<0.000000e+00> : vector<16x64xf32>
    %140 = tpu.matmul %137, %139, %cst_111 {dimension_numbers = #tpu.dot_dimension_numbers<[1], [0], [0], [1], [0, 0, 1, 1], [], []>} : vector<16x32xf32>, vector<32x64xf32>, vector<16x64xf32> -> vector<16x64xf32>
    %c0_112 = arith.constant 0 : index
    %c0_113 = arith.constant 0 : index
    %c0_114 = arith.constant 0 : index
    %141 = vector.load %arg5[%c0_112, %c0_113, %c0_114] : memref<2x1x64xf32, #tpu.memory_space<vmem>>, vector<1x1x64xf32>
    %142 = vector.shape_cast %141 : vector<1x1x64xf32> to vector<1x64xf32>
    %143 = vector.broadcast %142 : vector<1x64xf32> to vector<16x64xf32>
    %144 = arith.addf %140, %143 : vector<16x64xf32>
    %cst_115 = arith.constant 5.000000e-01 : f32
    %145 = vector.broadcast %cst_115 : f32 to vector<16x64xf32>
    %146 = arith.mulf %145, %144 : vector<16x64xf32>
    %cst_116 = arith.constant 4.471500e-02 : f32
    %147 = vector.broadcast %cst_116 : f32 to vector<16x64xf32>
    %148 = arith.mulf %147, %144 : vector<16x64xf32>
    %149 = arith.mulf %148, %144 : vector<16x64xf32>
    %150 = arith.mulf %149, %144 : vector<16x64xf32>
    %151 = arith.addf %144, %150 : vector<16x64xf32>
    %cst_117 = arith.constant 0.797884583 : f32
    %152 = vector.broadcast %cst_117 : f32 to vector<16x64xf32>
    %153 = arith.mulf %152, %151 : vector<16x64xf32>
    %154 = math.tanh %153 : vector<16x64xf32>
    %cst_118 = arith.constant 1.000000e+00 : f32
    %155 = vector.broadcast %cst_118 : f32 to vector<16x64xf32>
    %156 = arith.addf %155, %154 : vector<16x64xf32>
    %157 = arith.mulf %146, %156 : vector<16x64xf32>
    %c0_119 = arith.constant 0 : index
    %c0_120 = arith.constant 0 : index
    %c0_121 = arith.constant 0 : index
    %158 = vector.load %arg6[%c0_119, %c0_120, %c0_121] : memref<2x64x32xf32, #tpu.memory_space<vmem>>, vector<1x64x32xf32>
    %159 = vector.shape_cast %158 : vector<1x64x32xf32> to vector<64x32xf32>
    %cst_122 = arith.constant dense<0.000000e+00> : vector<16x32xf32>
    %160 = tpu.matmul %157, %159, %cst_122 {dimension_numbers = #tpu.dot_dimension_numbers<[1], [0], [0], [1], [0, 0, 1, 1], [], []>} : vector<16x64xf32>, vector<64x32xf32>, vector<16x32xf32> -> vector<16x32xf32>
    %c0_123 = arith.constant 0 : index
    %c3 = arith.constant 3 : index
    %c0_124 = arith.constant 0 : index
    %161 = vector.load %arg7[%c0_123, %c3, %c0_124] : memref<2x6x32xf32, #tpu.memory_space<vmem>>, vector<1x1x32xf32>
    %162 = vector.shape_cast %161 : vector<1x1x32xf32> to vector<1x32xf32>
    %163 = vector.broadcast %162 : vector<1x32xf32> to vector<16x32xf32>
    %164 = arith.addf %160, %163 : vector<16x32xf32>
    %165 = arith.addf %164, %137 : vector<16x32xf32>
    %c0_125 = arith.constant 0 : index
    %c4 = arith.constant 4 : index
    %c0_126 = arith.constant 0 : index
    %166 = vector.load %arg7[%c0_125, %c4, %c0_126] : memref<2x6x32xf32, #tpu.memory_space<vmem>>, vector<1x1x32xf32>
    %167 = vector.shape_cast %166 : vector<1x1x32xf32> to vector<1x32xf32>
    %c0_127 = arith.constant 0 : index
    %c5 = arith.constant 5 : index
    %c0_128 = arith.constant 0 : index
    %168 = vector.load %arg7[%c0_127, %c5, %c0_128] : memref<2x6x32xf32, #tpu.memory_space<vmem>>, vector<1x1x32xf32>
    %169 = vector.shape_cast %168 : vector<1x1x32xf32> to vector<1x32xf32>
    %cst_129 = arith.constant dense<0.000000e+00> : vector<16xf32>
    %170 = vector.multi_reduction <add>, %165, %cst_129 [1] : vector<16x32xf32> to vector<16xf32>
    %171 = vector.shape_cast %170 : vector<16xf32> to vector<16x1xf32>
    %cst_130 = arith.constant 3.200000e+01 : f32
    %172 = vector.broadcast %cst_130 : f32 to vector<16x1xf32>
    %173 = arith.divf %171, %172 : vector<16x1xf32>
    %174 = vector.broadcast %173 : vector<16x1xf32> to vector<16x32xf32>
    %175 = arith.subf %165, %174 : vector<16x32xf32>
    %176 = arith.mulf %175, %175 : vector<16x32xf32>
    %cst_131 = arith.constant dense<0.000000e+00> : vector<16xf32>
    %177 = vector.multi_reduction <add>, %176, %cst_131 [1] : vector<16x32xf32> to vector<16xf32>
    %178 = vector.shape_cast %177 : vector<16xf32> to vector<16x1xf32>
    %cst_132 = arith.constant 3.200000e+01 : f32
    %179 = vector.broadcast %cst_132 : f32 to vector<16x1xf32>
    %180 = arith.divf %178, %179 : vector<16x1xf32>
    %cst_133 = arith.constant 9.99999996E-13 : f32
    %181 = vector.broadcast %cst_133 : f32 to vector<16x1xf32>
    %182 = arith.addf %180, %181 : vector<16x1xf32>
    %183 = math.rsqrt %182 : vector<16x1xf32>
    %184 = vector.broadcast %183 : vector<16x1xf32> to vector<16x32xf32>
    %185 = arith.mulf %175, %184 : vector<16x32xf32>
    %186 = vector.broadcast %167 : vector<1x32xf32> to vector<16x32xf32>
    %187 = arith.mulf %185, %186 : vector<16x32xf32>
    %188 = vector.broadcast %169 : vector<1x32xf32> to vector<16x32xf32>
    %189 = arith.addf %187, %188 : vector<16x32xf32>
    %c1_134 = arith.constant 1 : index
    %c0_135 = arith.constant 0 : index
    %c0_136 = arith.constant 0 : index
    %c0_137 = arith.constant 0 : index
    %c0_138 = arith.constant 0 : index
    %190 = vector.load %arg1[%c1_134, %c0_135, %c0_136, %c0_137, %c0_138] : memref<2x3x2x32x16xf32, #tpu.memory_space<vmem>>, vector<1x1x1x32x16xf32>
    %191 = vector.shape_cast %190 : vector<1x1x1x32x16xf32> to vector<32x16xf32>
    %cst_139 = arith.constant dense<0.000000e+00> : vector<16x16xf32>
    %192 = tpu.matmul %189, %191, %cst_139 {dimension_numbers = #tpu.dot_dimension_numbers<[1], [0], [0], [1], [0, 0, 1, 1], [], []>} : vector<16x32xf32>, vector<32x16xf32>, vector<16x16xf32> -> vector<16x16xf32>
    %c1_140 = arith.constant 1 : index
    %c0_141 = arith.constant 0 : index
    %c0_142 = arith.constant 0 : index
    %c0_143 = arith.constant 0 : index
    %c0_144 = arith.constant 0 : index
    %193 = vector.load %arg2[%c1_140, %c0_141, %c0_142, %c0_143, %c0_144] : memref<2x3x2x1x16xf32, #tpu.memory_space<vmem>>, vector<1x1x1x1x16xf32>
    %194 = vector.shape_cast %193 : vector<1x1x1x1x16xf32> to vector<1x16xf32>
    %195 = vector.broadcast %194 : vector<1x16xf32> to vector<16x16xf32>
    %196 = arith.addf %192, %195 : vector<16x16xf32>
    %c1_145 = arith.constant 1 : index
    %c1_146 = arith.constant 1 : index
    %c0_147 = arith.constant 0 : index
    %c0_148 = arith.constant 0 : index
    %c0_149 = arith.constant 0 : index
    %197 = vector.load %arg1[%c1_145, %c1_146, %c0_147, %c0_148, %c0_149] : memref<2x3x2x32x16xf32, #tpu.memory_space<vmem>>, vector<1x1x1x32x16xf32>
    %198 = vector.shape_cast %197 : vector<1x1x1x32x16xf32> to vector<32x16xf32>
    %cst_150 = arith.constant dense<0.000000e+00> : vector<16x16xf32>
    %199 = tpu.matmul %189, %198, %cst_150 {dimension_numbers = #tpu.dot_dimension_numbers<[1], [0], [0], [1], [0, 0, 1, 1], [], []>} : vector<16x32xf32>, vector<32x16xf32>, vector<16x16xf32> -> vector<16x16xf32>
    %c1_151 = arith.constant 1 : index
    %c1_152 = arith.constant 1 : index
    %c0_153 = arith.constant 0 : index
    %c0_154 = arith.constant 0 : index
    %c0_155 = arith.constant 0 : index
    %200 = vector.load %arg2[%c1_151, %c1_152, %c0_153, %c0_154, %c0_155] : memref<2x3x2x1x16xf32, #tpu.memory_space<vmem>>, vector<1x1x1x1x16xf32>
    %201 = vector.shape_cast %200 : vector<1x1x1x1x16xf32> to vector<1x16xf32>
    %202 = vector.broadcast %201 : vector<1x16xf32> to vector<16x16xf32>
    %203 = arith.addf %199, %202 : vector<16x16xf32>
    %c1_156 = arith.constant 1 : index
    %c2_157 = arith.constant 2 : index
    %c0_158 = arith.constant 0 : index
    %c0_159 = arith.constant 0 : index
    %c0_160 = arith.constant 0 : index
    %204 = vector.load %arg1[%c1_156, %c2_157, %c0_158, %c0_159, %c0_160] : memref<2x3x2x32x16xf32, #tpu.memory_space<vmem>>, vector<1x1x1x32x16xf32>
    %205 = vector.shape_cast %204 : vector<1x1x1x32x16xf32> to vector<32x16xf32>
    %cst_161 = arith.constant dense<0.000000e+00> : vector<16x16xf32>
    %206 = tpu.matmul %189, %205, %cst_161 {dimension_numbers = #tpu.dot_dimension_numbers<[1], [0], [0], [1], [0, 0, 1, 1], [], []>} : vector<16x32xf32>, vector<32x16xf32>, vector<16x16xf32> -> vector<16x16xf32>
    %c1_162 = arith.constant 1 : index
    %c2_163 = arith.constant 2 : index
    %c0_164 = arith.constant 0 : index
    %c0_165 = arith.constant 0 : index
    %c0_166 = arith.constant 0 : index
    %207 = vector.load %arg2[%c1_162, %c2_163, %c0_164, %c0_165, %c0_166] : memref<2x3x2x1x16xf32, #tpu.memory_space<vmem>>, vector<1x1x1x1x16xf32>
    %208 = vector.shape_cast %207 : vector<1x1x1x1x16xf32> to vector<1x16xf32>
    %209 = vector.broadcast %208 : vector<1x16xf32> to vector<16x16xf32>
    %210 = arith.addf %206, %209 : vector<16x16xf32>
    %211 = vector.shape_cast %196 : vector<16x16xf32> to vector<2x8x16xf32>
    %212 = vector.shape_cast %203 : vector<16x16xf32> to vector<2x8x16xf32>
    %213 = vector.shape_cast %210 : vector<16x16xf32> to vector<2x8x16xf32>
    "tpu.trace_start"() <{level = 10 : i32, message = "bqd,bkd->bqk"}> : () -> ()
    %cst_167 = arith.constant dense<0.000000e+00> : vector<2x8x8xf32>
    %214 = tpu.matmul %211, %212, %cst_167 {dimension_numbers = #tpu.dot_dimension_numbers<[2], [2], [1], [1], [0, 0, 0, 1, 1, 1], [0], [0]>} : vector<2x8x16xf32>, vector<2x8x16xf32>, vector<2x8x8xf32> -> vector<2x8x8xf32>
    "tpu.trace_stop"() : () -> ()
    %cst_168 = arith.constant 2.500000e-01 : f32
    %215 = vector.broadcast %cst_168 : f32 to vector<2x8x8xf32>
    %216 = arith.mulf %214, %215 : vector<2x8x8xf32>
    %cst_169 = arith.constant dense<0xFF800000> : vector<2x8xf32>
    %217 = vector.multi_reduction <maximumf>, %216, %cst_169 [2] : vector<2x8x8xf32> to vector<2x8xf32>
    %218 = vector.shape_cast %217 : vector<2x8xf32> to vector<2x8x1xf32>
    %219 = vector.broadcast %218 : vector<2x8x1xf32> to vector<2x8x8xf32>
    %220 = arith.subf %216, %219 : vector<2x8x8xf32>
    %221 = math.exp %220 : vector<2x8x8xf32>
    %cst_170 = arith.constant dense<0.000000e+00> : vector<2x8xf32>
    %222 = vector.multi_reduction <add>, %221, %cst_170 [2] : vector<2x8x8xf32> to vector<2x8xf32>
    %223 = vector.shape_cast %222 : vector<2x8xf32> to vector<2x8x1xf32>
    %224 = tpu.reciprocal %223 {approx = true} : vector<2x8x1xf32> -> vector<2x8x1xf32>
    %225 = vector.broadcast %224 : vector<2x8x1xf32> to vector<2x8x8xf32>
    %226 = arith.mulf %221, %225 : vector<2x8x8xf32>
    "tpu.trace_start"() <{level = 10 : i32, message = "bqk,bkd->bqd"}> : () -> ()
    %cst_171 = arith.constant dense<0.000000e+00> : vector<2x8x16xf32>
    %227 = tpu.matmul %226, %213, %cst_171 {dimension_numbers = #tpu.dot_dimension_numbers<[2], [1], [1], [2], [0, 0, 0, 1, 1, 2], [0], [0]>} : vector<2x8x8xf32>, vector<2x8x16xf32>, vector<2x8x16xf32> -> vector<2x8x16xf32>
    "tpu.trace_stop"() : () -> ()
    %228 = vector.shape_cast %227 : vector<2x8x16xf32> to vector<16x16xf32>
    %c1_172 = arith.constant 1 : index
    %c0_173 = arith.constant 0 : index
    %c0_174 = arith.constant 0 : index
    %c0_175 = arith.constant 0 : index
    %229 = vector.load %arg3[%c1_172, %c0_173, %c0_174, %c0_175] : memref<2x2x16x32xf32, #tpu.memory_space<vmem>>, vector<1x1x16x32xf32>
    %230 = vector.shape_cast %229 : vector<1x1x16x32xf32> to vector<16x32xf32>
    %cst_176 = arith.constant dense<0.000000e+00> : vector<16x32xf32>
    %231 = tpu.matmul %228, %230, %cst_176 {dimension_numbers = #tpu.dot_dimension_numbers<[1], [0], [0], [1], [0, 0, 1, 1], [], []>} : vector<16x16xf32>, vector<16x32xf32>, vector<16x32xf32> -> vector<16x32xf32>
    %c1_177 = arith.constant 1 : index
    %c0_178 = arith.constant 0 : index
    %c1_179 = arith.constant 1 : index
    %c0_180 = arith.constant 0 : index
    %c0_181 = arith.constant 0 : index
    %232 = vector.load %arg1[%c1_177, %c0_178, %c1_179, %c0_180, %c0_181] : memref<2x3x2x32x16xf32, #tpu.memory_space<vmem>>, vector<1x1x1x32x16xf32>
    %233 = vector.shape_cast %232 : vector<1x1x1x32x16xf32> to vector<32x16xf32>
    %cst_182 = arith.constant dense<0.000000e+00> : vector<16x16xf32>
    %234 = tpu.matmul %189, %233, %cst_182 {dimension_numbers = #tpu.dot_dimension_numbers<[1], [0], [0], [1], [0, 0, 1, 1], [], []>} : vector<16x32xf32>, vector<32x16xf32>, vector<16x16xf32> -> vector<16x16xf32>
    %c1_183 = arith.constant 1 : index
    %c0_184 = arith.constant 0 : index
    %c1_185 = arith.constant 1 : index
    %c0_186 = arith.constant 0 : index
    %c0_187 = arith.constant 0 : index
    %235 = vector.load %arg2[%c1_183, %c0_184, %c1_185, %c0_186, %c0_187] : memref<2x3x2x1x16xf32, #tpu.memory_space<vmem>>, vector<1x1x1x1x16xf32>
    %236 = vector.shape_cast %235 : vector<1x1x1x1x16xf32> to vector<1x16xf32>
    %237 = vector.broadcast %236 : vector<1x16xf32> to vector<16x16xf32>
    %238 = arith.addf %234, %237 : vector<16x16xf32>
    %c1_188 = arith.constant 1 : index
    %c1_189 = arith.constant 1 : index
    %c1_190 = arith.constant 1 : index
    %c0_191 = arith.constant 0 : index
    %c0_192 = arith.constant 0 : index
    %239 = vector.load %arg1[%c1_188, %c1_189, %c1_190, %c0_191, %c0_192] : memref<2x3x2x32x16xf32, #tpu.memory_space<vmem>>, vector<1x1x1x32x16xf32>
    %240 = vector.shape_cast %239 : vector<1x1x1x32x16xf32> to vector<32x16xf32>
    %cst_193 = arith.constant dense<0.000000e+00> : vector<16x16xf32>
    %241 = tpu.matmul %189, %240, %cst_193 {dimension_numbers = #tpu.dot_dimension_numbers<[1], [0], [0], [1], [0, 0, 1, 1], [], []>} : vector<16x32xf32>, vector<32x16xf32>, vector<16x16xf32> -> vector<16x16xf32>
    %c1_194 = arith.constant 1 : index
    %c1_195 = arith.constant 1 : index
    %c1_196 = arith.constant 1 : index
    %c0_197 = arith.constant 0 : index
    %c0_198 = arith.constant 0 : index
    %242 = vector.load %arg2[%c1_194, %c1_195, %c1_196, %c0_197, %c0_198] : memref<2x3x2x1x16xf32, #tpu.memory_space<vmem>>, vector<1x1x1x1x16xf32>
    %243 = vector.shape_cast %242 : vector<1x1x1x1x16xf32> to vector<1x16xf32>
    %244 = vector.broadcast %243 : vector<1x16xf32> to vector<16x16xf32>
    %245 = arith.addf %241, %244 : vector<16x16xf32>
    %c1_199 = arith.constant 1 : index
    %c2_200 = arith.constant 2 : index
    %c1_201 = arith.constant 1 : index
    %c0_202 = arith.constant 0 : index
    %c0_203 = arith.constant 0 : index
    %246 = vector.load %arg1[%c1_199, %c2_200, %c1_201, %c0_202, %c0_203] : memref<2x3x2x32x16xf32, #tpu.memory_space<vmem>>, vector<1x1x1x32x16xf32>
    %247 = vector.shape_cast %246 : vector<1x1x1x32x16xf32> to vector<32x16xf32>
    %cst_204 = arith.constant dense<0.000000e+00> : vector<16x16xf32>
    %248 = tpu.matmul %189, %247, %cst_204 {dimension_numbers = #tpu.dot_dimension_numbers<[1], [0], [0], [1], [0, 0, 1, 1], [], []>} : vector<16x32xf32>, vector<32x16xf32>, vector<16x16xf32> -> vector<16x16xf32>
    %c1_205 = arith.constant 1 : index
    %c2_206 = arith.constant 2 : index
    %c1_207 = arith.constant 1 : index
    %c0_208 = arith.constant 0 : index
    %c0_209 = arith.constant 0 : index
    %249 = vector.load %arg2[%c1_205, %c2_206, %c1_207, %c0_208, %c0_209] : memref<2x3x2x1x16xf32, #tpu.memory_space<vmem>>, vector<1x1x1x1x16xf32>
    %250 = vector.shape_cast %249 : vector<1x1x1x1x16xf32> to vector<1x16xf32>
    %251 = vector.broadcast %250 : vector<1x16xf32> to vector<16x16xf32>
    %252 = arith.addf %248, %251 : vector<16x16xf32>
    %253 = vector.shape_cast %238 : vector<16x16xf32> to vector<2x8x16xf32>
    %254 = vector.shape_cast %245 : vector<16x16xf32> to vector<2x8x16xf32>
    %255 = vector.shape_cast %252 : vector<16x16xf32> to vector<2x8x16xf32>
    "tpu.trace_start"() <{level = 10 : i32, message = "bqd,bkd->bqk"}> : () -> ()
    %cst_210 = arith.constant dense<0.000000e+00> : vector<2x8x8xf32>
    %256 = tpu.matmul %253, %254, %cst_210 {dimension_numbers = #tpu.dot_dimension_numbers<[2], [2], [1], [1], [0, 0, 0, 1, 1, 1], [0], [0]>} : vector<2x8x16xf32>, vector<2x8x16xf32>, vector<2x8x8xf32> -> vector<2x8x8xf32>
    "tpu.trace_stop"() : () -> ()
    %cst_211 = arith.constant 2.500000e-01 : f32
    %257 = vector.broadcast %cst_211 : f32 to vector<2x8x8xf32>
    %258 = arith.mulf %256, %257 : vector<2x8x8xf32>
    %cst_212 = arith.constant dense<0xFF800000> : vector<2x8xf32>
    %259 = vector.multi_reduction <maximumf>, %258, %cst_212 [2] : vector<2x8x8xf32> to vector<2x8xf32>
    %260 = vector.shape_cast %259 : vector<2x8xf32> to vector<2x8x1xf32>
    %261 = vector.broadcast %260 : vector<2x8x1xf32> to vector<2x8x8xf32>
    %262 = arith.subf %258, %261 : vector<2x8x8xf32>
    %263 = math.exp %262 : vector<2x8x8xf32>
    %cst_213 = arith.constant dense<0.000000e+00> : vector<2x8xf32>
    %264 = vector.multi_reduction <add>, %263, %cst_213 [2] : vector<2x8x8xf32> to vector<2x8xf32>
    %265 = vector.shape_cast %264 : vector<2x8xf32> to vector<2x8x1xf32>
    %266 = tpu.reciprocal %265 {approx = true} : vector<2x8x1xf32> -> vector<2x8x1xf32>
    %267 = vector.broadcast %266 : vector<2x8x1xf32> to vector<2x8x8xf32>
    %268 = arith.mulf %263, %267 : vector<2x8x8xf32>
    "tpu.trace_start"() <{level = 10 : i32, message = "bqk,bkd->bqd"}> : () -> ()
    %cst_214 = arith.constant dense<0.000000e+00> : vector<2x8x16xf32>
    %269 = tpu.matmul %268, %255, %cst_214 {dimension_numbers = #tpu.dot_dimension_numbers<[2], [1], [1], [2], [0, 0, 0, 1, 1, 2], [0], [0]>} : vector<2x8x8xf32>, vector<2x8x16xf32>, vector<2x8x16xf32> -> vector<2x8x16xf32>
    "tpu.trace_stop"() : () -> ()
    %270 = vector.shape_cast %269 : vector<2x8x16xf32> to vector<16x16xf32>
    %c1_215 = arith.constant 1 : index
    %c1_216 = arith.constant 1 : index
    %c0_217 = arith.constant 0 : index
    %c0_218 = arith.constant 0 : index
    %271 = vector.load %arg3[%c1_215, %c1_216, %c0_217, %c0_218] : memref<2x2x16x32xf32, #tpu.memory_space<vmem>>, vector<1x1x16x32xf32>
    %272 = vector.shape_cast %271 : vector<1x1x16x32xf32> to vector<16x32xf32>
    %cst_219 = arith.constant dense<0.000000e+00> : vector<16x32xf32>
    %273 = tpu.matmul %270, %272, %cst_219 {dimension_numbers = #tpu.dot_dimension_numbers<[1], [0], [0], [1], [0, 0, 1, 1], [], []>} : vector<16x16xf32>, vector<16x32xf32>, vector<16x32xf32> -> vector<16x32xf32>
    %274 = arith.addf %231, %273 : vector<16x32xf32>
    %c1_220 = arith.constant 1 : index
    %c0_221 = arith.constant 0 : index
    %c0_222 = arith.constant 0 : index
    %275 = vector.load %arg7[%c1_220, %c0_221, %c0_222] : memref<2x6x32xf32, #tpu.memory_space<vmem>>, vector<1x1x32xf32>
    %276 = vector.shape_cast %275 : vector<1x1x32xf32> to vector<1x32xf32>
    %277 = vector.broadcast %276 : vector<1x32xf32> to vector<16x32xf32>
    %278 = arith.addf %274, %277 : vector<16x32xf32>
    %279 = arith.addf %278, %189 : vector<16x32xf32>
    %c1_223 = arith.constant 1 : index
    %c1_224 = arith.constant 1 : index
    %c0_225 = arith.constant 0 : index
    %280 = vector.load %arg7[%c1_223, %c1_224, %c0_225] : memref<2x6x32xf32, #tpu.memory_space<vmem>>, vector<1x1x32xf32>
    %281 = vector.shape_cast %280 : vector<1x1x32xf32> to vector<1x32xf32>
    %c1_226 = arith.constant 1 : index
    %c2_227 = arith.constant 2 : index
    %c0_228 = arith.constant 0 : index
    %282 = vector.load %arg7[%c1_226, %c2_227, %c0_228] : memref<2x6x32xf32, #tpu.memory_space<vmem>>, vector<1x1x32xf32>
    %283 = vector.shape_cast %282 : vector<1x1x32xf32> to vector<1x32xf32>
    %cst_229 = arith.constant dense<0.000000e+00> : vector<16xf32>
    %284 = vector.multi_reduction <add>, %279, %cst_229 [1] : vector<16x32xf32> to vector<16xf32>
    %285 = vector.shape_cast %284 : vector<16xf32> to vector<16x1xf32>
    %cst_230 = arith.constant 3.200000e+01 : f32
    %286 = vector.broadcast %cst_230 : f32 to vector<16x1xf32>
    %287 = arith.divf %285, %286 : vector<16x1xf32>
    %288 = vector.broadcast %287 : vector<16x1xf32> to vector<16x32xf32>
    %289 = arith.subf %279, %288 : vector<16x32xf32>
    %290 = arith.mulf %289, %289 : vector<16x32xf32>
    %cst_231 = arith.constant dense<0.000000e+00> : vector<16xf32>
    %291 = vector.multi_reduction <add>, %290, %cst_231 [1] : vector<16x32xf32> to vector<16xf32>
    %292 = vector.shape_cast %291 : vector<16xf32> to vector<16x1xf32>
    %cst_232 = arith.constant 3.200000e+01 : f32
    %293 = vector.broadcast %cst_232 : f32 to vector<16x1xf32>
    %294 = arith.divf %292, %293 : vector<16x1xf32>
    %cst_233 = arith.constant 9.99999996E-13 : f32
    %295 = vector.broadcast %cst_233 : f32 to vector<16x1xf32>
    %296 = arith.addf %294, %295 : vector<16x1xf32>
    %297 = math.rsqrt %296 : vector<16x1xf32>
    %298 = vector.broadcast %297 : vector<16x1xf32> to vector<16x32xf32>
    %299 = arith.mulf %289, %298 : vector<16x32xf32>
    %300 = vector.broadcast %281 : vector<1x32xf32> to vector<16x32xf32>
    %301 = arith.mulf %299, %300 : vector<16x32xf32>
    %302 = vector.broadcast %283 : vector<1x32xf32> to vector<16x32xf32>
    %303 = arith.addf %301, %302 : vector<16x32xf32>
    %c1_234 = arith.constant 1 : index
    %c0_235 = arith.constant 0 : index
    %c0_236 = arith.constant 0 : index
    %304 = vector.load %arg4[%c1_234, %c0_235, %c0_236] : memref<2x32x64xf32, #tpu.memory_space<vmem>>, vector<1x32x64xf32>
    %305 = vector.shape_cast %304 : vector<1x32x64xf32> to vector<32x64xf32>
    %cst_237 = arith.constant dense<0.000000e+00> : vector<16x64xf32>
    %306 = tpu.matmul %303, %305, %cst_237 {dimension_numbers = #tpu.dot_dimension_numbers<[1], [0], [0], [1], [0, 0, 1, 1], [], []>} : vector<16x32xf32>, vector<32x64xf32>, vector<16x64xf32> -> vector<16x64xf32>
    %c1_238 = arith.constant 1 : index
    %c0_239 = arith.constant 0 : index
    %c0_240 = arith.constant 0 : index
    %307 = vector.load %arg5[%c1_238, %c0_239, %c0_240] : memref<2x1x64xf32, #tpu.memory_space<vmem>>, vector<1x1x64xf32>
    %308 = vector.shape_cast %307 : vector<1x1x64xf32> to vector<1x64xf32>
    %309 = vector.broadcast %308 : vector<1x64xf32> to vector<16x64xf32>
    %310 = arith.addf %306, %309 : vector<16x64xf32>
    %cst_241 = arith.constant 5.000000e-01 : f32
    %311 = vector.broadcast %cst_241 : f32 to vector<16x64xf32>
    %312 = arith.mulf %311, %310 : vector<16x64xf32>
    %cst_242 = arith.constant 4.471500e-02 : f32
    %313 = vector.broadcast %cst_242 : f32 to vector<16x64xf32>
    %314 = arith.mulf %313, %310 : vector<16x64xf32>
    %315 = arith.mulf %314, %310 : vector<16x64xf32>
    %316 = arith.mulf %315, %310 : vector<16x64xf32>
    %317 = arith.addf %310, %316 : vector<16x64xf32>
    %cst_243 = arith.constant 0.797884583 : f32
    %318 = vector.broadcast %cst_243 : f32 to vector<16x64xf32>
    %319 = arith.mulf %318, %317 : vector<16x64xf32>
    %320 = math.tanh %319 : vector<16x64xf32>
    %cst_244 = arith.constant 1.000000e+00 : f32
    %321 = vector.broadcast %cst_244 : f32 to vector<16x64xf32>
    %322 = arith.addf %321, %320 : vector<16x64xf32>
    %323 = arith.mulf %312, %322 : vector<16x64xf32>
    %c1_245 = arith.constant 1 : index
    %c0_246 = arith.constant 0 : index
    %c0_247 = arith.constant 0 : index
    %324 = vector.load %arg6[%c1_245, %c0_246, %c0_247] : memref<2x64x32xf32, #tpu.memory_space<vmem>>, vector<1x64x32xf32>
    %325 = vector.shape_cast %324 : vector<1x64x32xf32> to vector<64x32xf32>
    %cst_248 = arith.constant dense<0.000000e+00> : vector<16x32xf32>
    %326 = tpu.matmul %323, %325, %cst_248 {dimension_numbers = #tpu.dot_dimension_numbers<[1], [0], [0], [1], [0, 0, 1, 1], [], []>} : vector<16x64xf32>, vector<64x32xf32>, vector<16x32xf32> -> vector<16x32xf32>
    %c1_249 = arith.constant 1 : index
    %c3_250 = arith.constant 3 : index
    %c0_251 = arith.constant 0 : index
    %327 = vector.load %arg7[%c1_249, %c3_250, %c0_251] : memref<2x6x32xf32, #tpu.memory_space<vmem>>, vector<1x1x32xf32>
    %328 = vector.shape_cast %327 : vector<1x1x32xf32> to vector<1x32xf32>
    %329 = vector.broadcast %328 : vector<1x32xf32> to vector<16x32xf32>
    %330 = arith.addf %326, %329 : vector<16x32xf32>
    %331 = arith.addf %330, %303 : vector<16x32xf32>
    %c1_252 = arith.constant 1 : index
    %c4_253 = arith.constant 4 : index
    %c0_254 = arith.constant 0 : index
    %332 = vector.load %arg7[%c1_252, %c4_253, %c0_254] : memref<2x6x32xf32, #tpu.memory_space<vmem>>, vector<1x1x32xf32>
    %333 = vector.shape_cast %332 : vector<1x1x32xf32> to vector<1x32xf32>
    %c1_255 = arith.constant 1 : index
    %c5_256 = arith.constant 5 : index
    %c0_257 = arith.constant 0 : index
    %334 = vector.load %arg7[%c1_255, %c5_256, %c0_257] : memref<2x6x32xf32, #tpu.memory_space<vmem>>, vector<1x1x32xf32>
    %335 = vector.shape_cast %334 : vector<1x1x32xf32> to vector<1x32xf32>
    %cst_258 = arith.constant dense<0.000000e+00> : vector<16xf32>
    %336 = vector.multi_reduction <add>, %331, %cst_258 [1] : vector<16x32xf32> to vector<16xf32>
    %337 = vector.shape_cast %336 : vector<16xf32> to vector<16x1xf32>
    %cst_259 = arith.constant 3.200000e+01 : f32
    %338 = vector.broadcast %cst_259 : f32 to vector<16x1xf32>
    %339 = arith.divf %337, %338 : vector<16x1xf32>
    %340 = vector.broadcast %339 : vector<16x1xf32> to vector<16x32xf32>
    %341 = arith.subf %331, %340 : vector<16x32xf32>
    %342 = arith.mulf %341, %341 : vector<16x32xf32>
    %cst_260 = arith.constant dense<0.000000e+00> : vector<16xf32>
    %343 = vector.multi_reduction <add>, %342, %cst_260 [1] : vector<16x32xf32> to vector<16xf32>
    %344 = vector.shape_cast %343 : vector<16xf32> to vector<16x1xf32>
    %cst_261 = arith.constant 3.200000e+01 : f32
    %345 = vector.broadcast %cst_261 : f32 to vector<16x1xf32>
    %346 = arith.divf %344, %345 : vector<16x1xf32>
    %cst_262 = arith.constant 9.99999996E-13 : f32
    %347 = vector.broadcast %cst_262 : f32 to vector<16x1xf32>
    %348 = arith.addf %346, %347 : vector<16x1xf32>
    %349 = math.rsqrt %348 : vector<16x1xf32>
    %350 = vector.broadcast %349 : vector<16x1xf32> to vector<16x32xf32>
    %351 = arith.mulf %341, %350 : vector<16x32xf32>
    %352 = vector.broadcast %333 : vector<1x32xf32> to vector<16x32xf32>
    %353 = arith.mulf %351, %352 : vector<16x32xf32>
    %354 = vector.broadcast %335 : vector<1x32xf32> to vector<16x32xf32>
    %355 = arith.addf %353, %354 : vector<16x32xf32>
    %356 = vector.extract_strided_slice %355 {offsets = [0, 0], sizes = [1, 32], strides = [1, 1]} : vector<16x32xf32> to vector<1x32xf32>
    %357 = vector.extract_strided_slice %355 {offsets = [8, 0], sizes = [1, 32], strides = [1, 1]} : vector<16x32xf32> to vector<1x32xf32>
    %358 = tpu.concatenate %356, %357 in 0 : vector<1x32xf32>, vector<1x32xf32> -> vector<2x32xf32>
    %c0_263 = arith.constant 0 : index
    %c0_264 = arith.constant 0 : index
    %c0_265 = arith.constant 0 : index
    %359 = vector.load %arg9[%c0_263, %c0_264, %c0_265] : memref<2x32x32xf32, #tpu.memory_space<vmem>>, vector<1x32x32xf32>
    %360 = vector.shape_cast %359 : vector<1x32x32xf32> to vector<32x32xf32>
    %cst_266 = arith.constant dense<0.000000e+00> : vector<2x32xf32>
    %361 = tpu.matmul %358, %360, %cst_266 {dimension_numbers = #tpu.dot_dimension_numbers<[1], [0], [0], [1], [0, 0, 1, 1], [], []>} : vector<2x32xf32>, vector<32x32xf32>, vector<2x32xf32> -> vector<2x32xf32>
    %c2_267 = arith.constant 2 : index
    %c0_268 = arith.constant 0 : index
    %362 = vector.load %arg8[%c2_267, %c0_268] : memref<6x32xf32, #tpu.memory_space<vmem>>, vector<1x32xf32>
    %363 = vector.broadcast %362 : vector<1x32xf32> to vector<2x32xf32>
    %364 = arith.addf %361, %363 : vector<2x32xf32>
    %365 = math.tanh %364 : vector<2x32xf32>
    %c0_269 = arith.constant 0 : index
    %c0_270 = arith.constant 0 : index
    %366 = vector.load %arg12[%c0_269, %c0_270] : memref<32x2xf32, #tpu.memory_space<vmem>>, vector<32x2xf32>
    %cst_271 = arith.constant dense<0.000000e+00> : vector<2x2xf32>
    %367 = tpu.matmul %365, %366, %cst_271 {dimension_numbers = #tpu.dot_dimension_numbers<[1], [0], [0], [1], [0, 0, 1, 1], [], []>} : vector<2x32xf32>, vector<32x2xf32>, vector<2x2xf32> -> vector<2x2xf32>
    %c0_272 = arith.constant 0 : index
    %c0_273 = arith.constant 0 : index
    %368 = vector.load %arg13[%c0_272, %c0_273] : memref<1x2xf32, #tpu.memory_space<vmem>>, vector<1x2xf32>
    %369 = vector.broadcast %368 : vector<1x2xf32> to vector<2x2xf32>
    %370 = arith.addf %367, %369 : vector<2x2xf32>
    %c0_274 = arith.constant 0 : index
    %c0_275 = arith.constant 0 : index
    %371 = vector.load %arg15[%c0_274, %c0_275] : memref<2x2xf32, #tpu.memory_space<vmem>>, vector<2x2xf32>
    tpu.vector_store %arg15[%c0_274, %c0_275], %370 {strides = array<i32>} : memref<2x2xf32, #tpu.memory_space<vmem>>, vector<2x2xf32>,
    %c1_276 = arith.constant 1 : index
    %c0_277 = arith.constant 0 : index
    %c0_278 = arith.constant 0 : index
    %372 = vector.load %arg9[%c1_276, %c0_277, %c0_278] : memref<2x32x32xf32, #tpu.memory_space<vmem>>, vector<1x32x32xf32>
    %373 = vector.shape_cast %372 : vector<1x32x32xf32> to vector<32x32xf32>
    %cst_279 = arith.constant dense<0.000000e+00> : vector<16x32xf32>
    %374 = tpu.matmul %355, %373, %cst_279 {dimension_numbers = #tpu.dot_dimension_numbers<[1], [0], [0], [1], [0, 0, 1, 1], [], []>} : vector<16x32xf32>, vector<32x32xf32>, vector<16x32xf32> -> vector<16x32xf32>
    %c3_280 = arith.constant 3 : index
    %c0_281 = arith.constant 0 : index
    %375 = vector.load %arg8[%c3_280, %c0_281] : memref<6x32xf32, #tpu.memory_space<vmem>>, vector<1x32xf32>
    %376 = vector.broadcast %375 : vector<1x32xf32> to vector<16x32xf32>
    %377 = arith.addf %374, %376 : vector<16x32xf32>
    %cst_282 = arith.constant 5.000000e-01 : f32
    %378 = vector.broadcast %cst_282 : f32 to vector<16x32xf32>
    %379 = arith.mulf %378, %377 : vector<16x32xf32>
    %cst_283 = arith.constant 4.471500e-02 : f32
    %380 = vector.broadcast %cst_283 : f32 to vector<16x32xf32>
    %381 = arith.mulf %380, %377 : vector<16x32xf32>
    %382 = arith.mulf %381, %377 : vector<16x32xf32>
    %383 = arith.mulf %382, %377 : vector<16x32xf32>
    %384 = arith.addf %377, %383 : vector<16x32xf32>
    %cst_284 = arith.constant 0.797884583 : f32
    %385 = vector.broadcast %cst_284 : f32 to vector<16x32xf32>
    %386 = arith.mulf %385, %384 : vector<16x32xf32>
    %387 = math.tanh %386 : vector<16x32xf32>
    %cst_285 = arith.constant 1.000000e+00 : f32
    %388 = vector.broadcast %cst_285 : f32 to vector<16x32xf32>
    %389 = arith.addf %388, %387 : vector<16x32xf32>
    %390 = arith.mulf %379, %389 : vector<16x32xf32>
    %c4_286 = arith.constant 4 : index
    %c0_287 = arith.constant 0 : index
    %391 = vector.load %arg8[%c4_286, %c0_287] : memref<6x32xf32, #tpu.memory_space<vmem>>, vector<1x32xf32>
    %c5_288 = arith.constant 5 : index
    %c0_289 = arith.constant 0 : index
    %392 = vector.load %arg8[%c5_288, %c0_289] : memref<6x32xf32, #tpu.memory_space<vmem>>, vector<1x32xf32>
    %cst_290 = arith.constant dense<0.000000e+00> : vector<16xf32>
    %393 = vector.multi_reduction <add>, %390, %cst_290 [1] : vector<16x32xf32> to vector<16xf32>
    %394 = vector.shape_cast %393 : vector<16xf32> to vector<16x1xf32>
    %cst_291 = arith.constant 3.200000e+01 : f32
    %395 = vector.broadcast %cst_291 : f32 to vector<16x1xf32>
    %396 = arith.divf %394, %395 : vector<16x1xf32>
    %397 = vector.broadcast %396 : vector<16x1xf32> to vector<16x32xf32>
    %398 = arith.subf %390, %397 : vector<16x32xf32>
    %399 = arith.mulf %398, %398 : vector<16x32xf32>
    %cst_292 = arith.constant dense<0.000000e+00> : vector<16xf32>
    %400 = vector.multi_reduction <add>, %399, %cst_292 [1] : vector<16x32xf32> to vector<16xf32>
    %401 = vector.shape_cast %400 : vector<16xf32> to vector<16x1xf32>
    %cst_293 = arith.constant 3.200000e+01 : f32
    %402 = vector.broadcast %cst_293 : f32 to vector<16x1xf32>
    %403 = arith.divf %401, %402 : vector<16x1xf32>
    %cst_294 = arith.constant 9.99999996E-13 : f32
    %404 = vector.broadcast %cst_294 : f32 to vector<16x1xf32>
    %405 = arith.addf %403, %404 : vector<16x1xf32>
    %406 = math.rsqrt %405 : vector<16x1xf32>
    %407 = vector.broadcast %406 : vector<16x1xf32> to vector<16x32xf32>
    %408 = arith.mulf %398, %407 : vector<16x32xf32>
    %409 = vector.broadcast %391 : vector<1x32xf32> to vector<16x32xf32>
    %410 = arith.mulf %408, %409 : vector<16x32xf32>
    %411 = vector.broadcast %392 : vector<1x32xf32> to vector<16x32xf32>
    %412 = arith.addf %410, %411 : vector<16x32xf32>
    %c0_295 = arith.constant 0 : index
    %c0_296 = arith.constant 0 : index
    %413 = vector.load %arg10[%c0_295, %c0_296] : memref<128x32xf32, #tpu.memory_space<vmem>>, vector<128x32xf32>
    %cst_297 = arith.constant dense<0.000000e+00> : vector<16x128xf32>
    %414 = tpu.matmul %412, %413, %cst_297 {dimension_numbers = #tpu.dot_dimension_numbers<[1], [1], [0], [0], [0, 0, 1, 0], [], []>} : vector<16x32xf32>, vector<128x32xf32>, vector<16x128xf32> -> vector<16x128xf32>
    %c0_298 = arith.constant 0 : index
    %c0_299 = arith.constant 0 : index
    %415 = vector.load %arg11[%c0_298, %c0_299] : memref<1x128xf32, #tpu.memory_space<vmem>>, vector<1x128xf32>
    %416 = vector.broadcast %415 : vector<1x128xf32> to vector<16x128xf32>
    %417 = arith.addf %414, %416 : vector<16x128xf32>
    %418 = vector.shape_cast %417 : vector<16x128xf32> to vector<2x8x128xf32>
    %c0_300 = arith.constant 0 : index
    %c0_301 = arith.constant 0 : index
    %c0_302 = arith.constant 0 : index
    %419 = vector.load %arg14[%c0_300, %c0_301, %c0_302] : memref<2x8x128xf32, #tpu.memory_space<vmem>>, vector<2x8x128xf32>
    tpu.vector_store %arg14[%c0_300, %c0_301, %c0_302], %418 {strides = array<i32>} : memref<2x8x128xf32, #tpu.memory_space<vmem>>, vector<2x8x128xf32>,
    return
  }
}

</mosaic_0001>

<bundles_post_ra>
// kernel: _lambda_.1
= control target key start
LH: loop header
LB: loop body
LE: loop exit
PB: predicated region body
PF: predicated region fallthrough
CT: control target
= control target key end

     0   :  { %21 = vsyncpa [#allocation3], 0  ;;  %vm55_vm0 = vcmask 261120   ;;  %s5793_s0 = inlined_call_operand.vmem [shape: f32[2,8,32], index: 0, kind: input, shape index: {}]   ;;  %s5794_s1 = inlined_call_operand.vmem [shape: f32[2,3,2,32,16], index: 1, kind: input, shape index: {}]   ;;  %s5795_s2 = inlined_call_operand.vmem [shape: f32[2,3,2,1,16], index: 2, kind: input, shape index: {}]   ;;  %s5796_s3 = inlined_call_operand.vmem [shape: f32[2,2,16,32], index: 3, kind: input, shape index: {}]   ;;  %s5797_s4 = inlined_call_operand.vmem [shape: f32[2,32,64], index: 4, kind: input, shape index: {}]   ;;  %s5798_s5 = inlined_call_operand.vmem [shape: f32[2,1,64], index: 5, kind: input, shape index: {}]   ;;  %s5799_s6 = inlined_call_operand.vmem [shape: f32[2,64,32], index: 6, kind: input, shape index: {}]   ;;  %s5800_s7 = inlined_call_operand.vmem [shape: f32[2,6,32], index: 7, kind: input, shape index: {}]   ;;  %s5801_s8 = inlined_call_operand.vmem [shape: f32[6,32], index: 8, kind: input, shape index: {}]   ;;  %s5802_s9 = inlined_call_operand.vmem [shape: f32[2,32,32], index: 9, kind: input, shape index: {}]   ;;  %s5803_s10 = inlined_call_operand.vmem [shape: f32[128,32], index: 10, kind: input, shape index: {}]   ;;  %s5804_s11 = inlined_call_operand.vmem [shape: f32[1,128], index: 11, kind: input, shape index: {}]   ;;  %s5805_s12 = inlined_call_operand.vmem [shape: f32[32,2], index: 12, kind: input, shape index: {}]   ;;  %s5806_s13 = inlined_call_operand.vmem [shape: f32[1,2], index: 13, kind: input, shape index: {}]   ;;  %s5807_s14 = inlined_call_operand.hbm [shape: f32[2,8,128], index: 14, kind: output, shape index: {0}]   ;;  %s5808_s15 = inlined_call_operand.hbm [shape: f32[2,2], index: 15, kind: output, shape index: {1}]  }
   0x1   :  { %v51_v0 = vld [vmem:[%s5793_s0] sm:$0xff]  ;;  %v52_v1 = vld [vmem:[%s5793_s0 + $0x8] sm:$0xff] }
   0x2   :  { %22 = vsyncpa [#allocation5], 0  ;;  %v56_v2 = vsel %vm55_vm0, %v51_v0, 0.0  ;;  %v59_v3 = vsel %vm55_vm0, %v52_v1, 0.0  ;;  %v95_v14 = vld [vmem:[%s5794_s1] sm:$0xff]  ;;  %v96_v15 = vld [vmem:[%s5794_s1 + $0x8] sm:$0xff] }
   0x3   :  { %57 = vadd.xlane.f32.xlu0 %v56_v2  ;;  %v4645_v16 = vpack.c.bf16 %v96_v15, %v95_v14  ;;  %v97_v17 = vld [vmem:[%s5794_s1 + $0x10] sm:$0xff]  ;;  %v98_v18 = vld [vmem:[%s5794_s1 + $0x18] sm:$0xff]  ;;  %v3892_v20 = vld [vmem:[%s5794_s1 + $0x40] sm:$0xff]  ;;  %v5002_v48 = vmov 0.0   ;;  %vm5003_vm1 = vmmov 0   ;;  %vm363_vm2 = vcmask 130048  }
   0x4   :  { %v4649_v19 = vpack.c.bf16 %v98_v18, %v97_v17  ;;  %v3893_v21 = vld [vmem:[%s5794_s1 + $0x48] sm:$0xff]  ;;  %v3887_v30 = vld [vmem:[%s5801_s8] ss:$0 sm:$0xff]  ;;  %v3888_v32 = vld [vmem:[%s5801_s8 + $0x1] ss:$0 sm:$0xff]  ;;  %4315 = vmatprep.subr.mxu1 %v5002_v48  ;;  %4317 = vmatprep.mubr.msk.f32.mxu1 %vm5003_vm1, %v5002_v48  ;;  %vm518_vm3 = vcmask 64512  }
   0x5   :  { %4646 = vmatprep.subr.bf16.mxu0 %v4645_v16  ;;  %v4653_v22 = vpack.c.bf16 %v3893_v21, %v3892_v20  ;;  %v3894_v37 = vld [vmem:[%s5794_s1 + $0x50] sm:$0xff]  ;;  %v3895_v38 = vld [vmem:[%s5794_s1 + $0x58] sm:$0xff]  ;;  %v3900_v42 = vld [vmem:[%s5794_s1 + $0x80] sm:$0xff]  ;;  %vm1612_vm4 = vcmask 523264   ;;  %vm3384_vm5 = vcmask 1040384   ;;  %vm3553_vm7 = vcmask 9216  }
   0x6   :  { %4648 = vmatpush3.bf16.msra.mxu0 %v4645_v16  ;;  %v4657_v41 = vpack.c.bf16 %v3895_v38, %v3894_v37  ;;  %v3901_v43 = vld [vmem:[%s5794_s1 + $0x88] sm:$0xff]  ;;  %v3902_v45 = vld [vmem:[%s5794_s1 + $0x90] sm:$0xff]  ;;  %v3903_v46 = vld [vmem:[%s5794_s1 + $0x98] sm:$0xff]  ;;  %s5005_s28 = smov [#allocation4]  }
   0x7   :  { %60 = vadd.xlane.f32.xlu0 %v59_v3  ;;  %4650 = vmatprep.subr.bf16.mxu0 %v4649_v19  ;;  %v4661_v44 = vpack.c.bf16 %v3901_v43, %v3900_v42  ;;  %v4665_v47 = vpack.c.bf16 %v3903_v46, %v3902_v45  ;;  %v3897_v51 = vld [vmem:[%s5795_s2 + $0x2] ss:$0 sm:$0xff]  ;;  %v3889_v53 = vld [vmem:[%s5795_s2] ss:$0 sm:$0xff]  ;;  %v3905_v59 = vld [vmem:[%s5795_s2 + $0x4] ss:$0 sm:$0xff] }
   0x8   :  { %v3914_v18 = vld [vmem:[%s5794_s1 + $0x20] sm:$0xff]  ;;  %v3931_v38 = vld [vmem:[%s5794_s1 + $0xa8] sm:$0xff]  ;;  %v3933_v42 = vld [vmem:[%s5794_s1 + $0xb8] sm:$0xff]  ;;  %s3875_s29 = sshll.u32 %s5005_s28, 4  ;;  %s3876_s29 = int_to_ptr.vmem [resolvable:$true] %s3875_s29 }
   0x9   :  { %v3930_v37 = vld [vmem:[%s5794_s1 + $0xa0] sm:$0xff]  ;;  %vm5675_vm6 = vmpackc.low %vm55_vm0, %vm55_vm0  ;;  %p4959_p1 = scmp.lt.s32.totalorder %s3876_s29, %s3876_s29 }
   0xa   :  { %4652 = vmatpush3.bf16.msra.mxu0 %v4649_v19  ;;  %v3915_v19 = vld [vmem:[%s5794_s1 + $0x28] sm:$0xff] }
   0xb   :  { %4654 = vmatprep.subr.bf16.mxu0 %v4653_v22  ;;  %v4669_v20 = vpack.c.bf16 %v3915_v19, %v3914_v18 }
  0x90   :  { %v58_v4 = vpop.xlane.xlu0 %57 }
  0x91   :  { %v63_v5 = vmul.f32 0.03125, %v58_v4 }
  0x93   :  { %v65_v6 = vsub.f32 %v51_v0, %v63_v5 }
  0x94   :  { %v61_v7 = vpop.xlane.xlu0 %60 }
  0x95   :  { %v64_v8 = vmul.f32 0.03125, %v61_v7  ;;  %v67_v9 = vmul.f32 %v65_v6, %v65_v6 }
  0x97   :  { %v66_v10 = vsub.f32 %v52_v1, %v64_v8  ;;  %v69_v11 = vsel %vm55_vm0, %v67_v9, 0.0 }
  0x98   :  { %70 = vadd.xlane.f32.xlu1 %v69_v11 }
  0x99   :  { %v68_v12 = vmul.f32 %v66_v10, %v66_v10 }
  0x9b   :  { %v72_v13 = vsel %vm55_vm0, %v68_v12, 0.0 }
  0x9c   :  { %73 = vadd.xlane.f32.xlu1 %v72_v13 }
 0x125   :  { %v71_v23 = vpop.xlane.xlu1 %70 }
 0x126   :  { %v75_v24 = vmul.f32 0.03125, %v71_v23  ;;  %v3916_v23 = vld [vmem:[%s5794_s1 + $0x30] sm:$0xff] }
 0x128   :  { %v77_v25 = vadd.f32 1e-12, %v75_v24  ;;  %v3917_v24 = vld [vmem:[%s5794_s1 + $0x38] sm:$0xff] }
 0x129   :  { %v74_v26 = vpop.xlane.xlu1 %73 }
 0x12a   :  { %4884 = vrsqrt.f32 %v77_v25  ;;  %v76_v27 = vmul.f32 0.03125, %v74_v26 }
 0x12c   :  { %v78_v28 = vadd.f32 1e-12, %v76_v27  ;;  %v4673_v27 = vpack.c.bf16 %v3917_v24, %v3916_v23  ;;  %v3944_v24 = vld [vmem:[%s5796_s3 + $0x10] sm:$0xff] }
 0x12e   :  { %4886 = vrsqrt.f32 %v78_v28  ;;  %v3922_v28 = vld [vmem:[%s5794_s1 + $0x60] sm:$0xff] }
 0x134   :  { %v4885_v29 = vpop.eup %4884 }
 0x135   :  { %v81_v31 = vmul.f32 %v4885_v29, %v65_v6  ;;  %v3923_v29 = vld [vmem:[%s5794_s1 + $0x68] sm:$0xff] }
 0x137   :  { %v87_v33 = vmul.f32 %v3887_v30, %v81_v31 }
 0x138   :  { %v4887_v34 = vpop.eup %4886 }
 0x139   :  { %v5123_v35 = vadd.f32 %v3888_v32, %v87_v33  ;;  %v82_v36 = vmul.f32 %v4887_v34, %v66_v10  ;;  %v3924_v33 = vld [vmem:[%s5794_s1 + $0x70] sm:$0xff]  ;;  %v3925_v34 = vld [vmem:[%s5794_s1 + $0x78] sm:$0xff] }
 0x13b   :  { %v88_v39 = vmul.f32 %v3887_v30, %v82_v36  ;;  %4285 = vmatprep.mubr.msk.f32.mxu0 %vm55_vm0, %v5123_v35  ;;  %v4681_v36 = vpack.c.bf16 %v3925_v34, %v3924_v33  ;;  %v3950_v34 = vld [vmem:[%s5800_s7] ss:$0 sm:$0xff] }
 0x13d   :  { %v5133_v40 = vadd.f32 %v3888_v32, %v88_v39  ;;  %v4677_v32 = vpack.c.bf16 %v3923_v29, %v3922_v28  ;;  %v4685_v39 = vpack.c.bf16 %v3931_v38, %v3930_v37  ;;  %v688_v28 = vld [vmem:[%s5796_s3 + $0x8] sm:$0xff] }
 0x13f   :  { %4286 = vmatmul.mubr.msk.f32.vlgmr.msra.gmra.mrb[0].mxu0 %vm55_vm0, %v5133_v40 }
 0x140   :  { %4656 = vmatpush3.bf16.msra.mxu0 %v4653_v22  ;;  %4296 = vmatprep.mubr.msk.f32.mxu0 %vm55_vm0, %v5123_v35 }
 0x141   :  { %4658 = vmatprep.subr.bf16.mxu0 %v4657_v41 }
 0x144   :  { %4660 = vmatpush3.bf16.msra.mxu0 %v4657_v41  ;;  %v3932_v41 = vld [vmem:[%s5794_s1 + $0xb0] sm:$0xff] }
 0x145   :  { %4662 = vmatprep.subr.bf16.mxu0 %v4661_v44  ;;  %v4689_v43 = vpack.c.bf16 %v3933_v42, %v3932_v41 }
 0x147   :  { %4297 = vmatmul.mubr.msk.f32.vlgmr.msra.gmra.mrb[2].mxu0 %vm55_vm0, %v5133_v40 }
 0x148   :  { %4664 = vmatpush3.bf16.msra.mxu0 %v4661_v44  ;;  %4307 = vmatprep.mubr.msk.f32.mxu0 %vm55_vm0, %v5123_v35 }
 0x149   :  { %4666 = vmatprep.subr.bf16.mxu0 %v4665_v47 }
 0x14c   :  { %4668 = vmatpush3.bf16.msra.mxu0 %v4665_v47 }
 0x14d   :  { %4310 = vmatprep.subr.mxu0 %v5002_v48 }
 0x14f   :  { %4308 = vmatmul.mubr.msk.f32.vlgmr.msra.gmra.mrb[4].mxu0 %vm55_vm0, %v5133_v40 }
 0x150   :  { %4312 = vmatprep.mubr.msk.f32.mxu0 %vm5003_vm1, %v5002_v48 }
 0x212   :  { %v4287_v49 = vpop.f32.mrb[0].mxu0 }
 0x213   :  { %v178_v50 = vpop.f32.mrb[1].mxu0  ;;  %v184_v57 = vadd.f32 %v4287_v49, %v3889_v53 }
 0x214   :  { %v179_v58 = vadd.f32 %v3889_v53, %v178_v50 }
 0x21a   :  { %v4298_v52 = vpop.f32.mrb[2].mxu0 }
 0x21b   :  { %v272_v54 = vadd.f32 %v4298_v52, %v3897_v51  ;;  %v266_v55 = vpop.f32.mrb[3].mxu0 }
 0x21c   :  { %v267_v56 = vadd.f32 %v3897_v51, %v266_v55  ;;  %v3927_v51 = vld [vmem:[%s5795_s2 + $0x3] ss:$0 sm:$0xff] }
 0x21d   :  { %4316 = vmatpush3.xpose.msk.msra.mxu1 %vm363_vm2, %v272_v54  ;;  %v3919_v54 = vld [vmem:[%s5795_s2 + $0x1] ss:$0 sm:$0xff] }
 0x21e   :  { %4311 = vmatpush3.xpose.msk.msra.mxu0 %vm363_vm2, %v267_v56  ;;  %4325 = vmatprep.subr.mxu1 %v5002_v48 }
 0x21f   :  { %4320 = vmatprep.subr.mxu0 %v5002_v48 }
 0x220   :  { %4318 = vmatmul.mubr.msk.f32.vlgmr.msra.gmra.mrb[0].mxu1 %vm363_vm2, %v184_v57 }
 0x221   :  { %4313 = vmatmul.mubr.msk.f32.vlgmr.msra.gmra.mrb[6].mxu0 %vm363_vm2, %v179_v58  ;;  %4327 = vmatprep.mubr.msk.f32.mxu1 %vm5003_vm1, %v5002_v48  ;;  %v3935_v58 = vld [vmem:[%s5795_s2 + $0x5] ss:$0 sm:$0xff] }
 0x222   :  { %v4309_v60 = vpop.f32.mrb[4].mxu0  ;;  %4322 = vmatprep.mubr.msk.f32.mxu0 %vm5003_vm1, %v5002_v48 }
 0x223   :  { %v360_v61 = vadd.f32 %v4309_v60, %v3905_v59  ;;  %v354_v62 = vpop.f32.mrb[5].mxu0 }
 0x224   :  { %v355_v63 = vadd.f32 %v3905_v59, %v354_v62 }
 0x225   :  { %4326 = vmatpush3.msra.mxu1 %v360_v61 }
 0x226   :  { %4321 = vmatpush3.msra.mxu0 %v355_v63  ;;  %4363 = vmatprep.subr.mxu1 %v5002_v48 }
 0x227   :  { %4670 = vmatprep.subr.bf16.mxu0 %v4669_v20 }
 0x2f3   :  { %v512_v0 = vpop.f32.mrb[0].mxu1 }
 0x2f4   :  { %v436_v1 = vpop.f32.mrb[6].mxu0  ;;  %v4319_v2 = vpop.f32.mrb[1].mxu1  ;;  %v517_v5 = vmul.f32 0.25, %v512_v0 }
 0x2f5   :  { %v516_v3 = vmul.f32 0.25, %v436_v1  ;;  %v4314_v4 = vpop.f32.mrb[7].mxu0 }
 0x2f6   :  { %v522_v7 = vsel %vm518_vm3, %v517_v5, -inf }
 0x2f7   :  { %v519_v6 = vsel %vm518_vm3, %v516_v3, -inf }
 0x2f8   :  { %520 = vmax.xlane.f32.xlu0 %v519_v6 }
 0x2fc   :  { %523 = vmax.xlane.f32.xlu0 %v522_v7 }
 0x385   :  { %v521_v8 = vpop.xlane.xlu0 %520 }
 0x386   :  { %v525_v9 = vsub.f32 %v516_v3, %v521_v8 }
 0x388   :  { %v527_v10 = vmul.f32 1.442695, %v525_v9 }
 0x389   :  { %v524_v11 = vpop.xlane.xlu0 %523 }
 0x38a   :  { %4888 = vpow2.f32 %v527_v10  ;;  %v526_v12 = vsub.f32 %v517_v5, %v524_v11 }
 0x38c   :  { %v529_v13 = vmul.f32 1.442695, %v526_v12 }
 0x38e   :  { %4890 = vpow2.f32 %v529_v13 }
 0x394   :  { %v4889_v14 = vpop.eup %4888 }
 0x395   :  { %v531_v15 = vsel %vm518_vm3, %v4889_v14, 0.0 }
 0x396   :  { %532 = vadd.xlane.f32.xlu1 %v531_v15 }
 0x398   :  { %v4891_v16 = vpop.eup %4890 }
 0x399   :  { %v534_v17 = vsel %vm518_vm3, %v4891_v16, 0.0 }
 0x39a   :  { %535 = vadd.xlane.f32.xlu1 %v534_v17 }
 0x423   :  { %v533_v21 = vpop.xlane.xlu1 %532 }
 0x424   :  { %4892 = vrcp.f32 %v533_v21 }
 0x427   :  { %v536_v22 = vpop.xlane.xlu1 %535 }
 0x428   :  { %4894 = vrcp.f32 %v536_v22 }
 0x42e   :  { %v4893_v25 = vpop.eup %4892 }
 0x42f   :  { %v539_v26 = vmul.f32 %v4893_v25, %v4889_v14  ;;  %v3945_v25 = vld [vmem:[%s5796_s3 + $0x18] sm:$0xff] }
 0x431   :  { %4323 = vmatmul.mubr.msk.f32.vlgmr.msra.gmra.mrb[8].mxu0 %vm518_vm3, %v539_v26  ;;  %v4693_v26 = vpack.c.bf16 %v3945_v25, %v3944_v24  ;;  %v3953_v24 = vld [vmem:[%s5798_s5] ss:$0 sm:$0xff] }
 0x432   :  { %v4895_v30 = vpop.eup %4894  ;;  %4672 = vmatpush3.bf16.msra.mxu0 %v4669_v20  ;;  %4338 = vmatprep.mubr.msk.f32.mxu0 %vm55_vm0, %v5123_v35 }
 0x433   :  { %v540_v31 = vmul.f32 %v4895_v30, %v4891_v16  ;;  %4674 = vmatprep.subr.bf16.mxu0 %v4673_v27 }
 0x435   :  { %4328 = vmatmul.mubr.msk.f32.vlgmr.msra.gmra.mrb[2].mxu1 %vm518_vm3, %v540_v31 }
 0x436   :  { %4676 = vmatpush3.bf16.msra.mxu0 %v4673_v27  ;;  %4365 = vmatprep.mubr.msk.f32.mxu1 %vm5003_vm1, %v5002_v48  ;;  %v687_v27 = vld [vmem:[%s5796_s3] sm:$0xff] }
 0x437   :  { %4678 = vmatprep.subr.bf16.mxu0 %v4677_v32  ;;  %v4697_v29 = vpack.c.bf16 %v688_v28, %v687_v27 }
 0x439   :  { %4339 = vmatmul.mubr.msk.f32.vlgmr.msra.gmra.mrb[10].mxu0 %vm55_vm0, %v5133_v40 }
 0x43a   :  { %4680 = vmatpush3.bf16.msra.mxu0 %v4677_v32  ;;  %4349 = vmatprep.mubr.msk.f32.mxu0 %vm55_vm0, %v5123_v35 }
 0x43b   :  { %4682 = vmatprep.subr.bf16.mxu0 %v4681_v36 }
 0x43e   :  { %4684 = vmatpush3.bf16.msra.mxu0 %v4681_v36 }
 0x43f   :  { %4686 = vmatprep.subr.bf16.mxu0 %v4685_v39 }
 0x441   :  { %4350 = vmatmul.mubr.msk.f32.vlgmr.msra.gmra.mrb[12].mxu0 %vm55_vm0, %v5133_v40 }
 0x442   :  { %4688 = vmatpush3.bf16.msra.mxu0 %v4685_v39  ;;  %4360 = vmatprep.mubr.msk.f32.mxu0 %vm55_vm0, %v5123_v35 }
 0x443   :  { %4690 = vmatprep.subr.bf16.mxu0 %v4689_v43 }
 0x446   :  { %4692 = vmatpush3.bf16.msra.mxu0 %v4689_v43 }
 0x447   :  { %4373 = vmatprep.subr.mxu0 %v5002_v48 }
 0x449   :  { %4361 = vmatmul.mubr.msk.f32.vlgmr.msra.gmra.mrb[14].mxu0 %vm55_vm0, %v5133_v40 }
 0x44a   :  { %4375 = vmatprep.mubr.msk.f32.mxu0 %vm5003_vm1, %v5002_v48 }
 0x504   :  { %v5242_v44 = vpop.f32.mrb[8].mxu0 }
 0x505   :  { %v4324_v45 = vpop.f32.mrb[9].mxu0 }
 0x508   :  { %v5244_v46 = vpop.f32.mrb[2].mxu1 }
 0x509   :  { %v4329_v47 = vpop.f32.mrb[3].mxu1 }
 0x50c   :  { %v4340_v49 = vpop.f32.mrb[10].mxu0 }
 0x50d   :  { %v768_v50 = vpop.f32.mrb[11].mxu0  ;;  %v774_v60 = vadd.f32 %v4340_v49, %v3919_v54 }
 0x50e   :  { %v769_v56 = vadd.f32 %v3919_v54, %v768_v50 }
 0x514   :  { %v4351_v52 = vpop.f32.mrb[12].mxu0 }
 0x515   :  { %v856_v53 = vpop.f32.mrb[13].mxu0  ;;  %v862_v57 = vadd.f32 %v4351_v52, %v3927_v51 }
 0x516   :  { %v857_v55 = vadd.f32 %v3927_v51, %v856_v53 }
 0x518   :  { %4364 = vmatpush3.xpose.msk.msra.mxu1 %vm363_vm2, %v857_v55  ;;  %v1490_v55 = vld [vmem:[%s5797_s4 + $0x8] sm:$0xff] }
 0x519   :  { %4368 = vmatprep.subr.mxu1 %v5002_v48 }
 0x51b   :  { %4366 = vmatmul.mubr.msk.f32.vlgmr.msra.gmra.mrb[4].mxu1 %vm363_vm2, %v769_v56 }
 0x51c   :  { %v4362_v59 = vpop.f32.mrb[14].mxu0  ;;  %4369 = vmatpush3.xpose.msk.msra.mxu1 %vm363_vm2, %v862_v57  ;;  %4370 = vmatprep.mubr.msk.f32.mxu1 %vm5003_vm1, %v5002_v48  ;;  %v1491_v57 = vld [vmem:[%s5797_s4 + $0x10] sm:$0xff] }
 0x51d   :  { %v950_v61 = vadd.f32 %v4362_v59, %v3935_v58  ;;  %v944_v62 = vpop.f32.mrb[15].mxu0  ;;  %4378 = vmatprep.subr.mxu1 %v5002_v48 }
 0x51e   :  { %v945_v63 = vadd.f32 %v3935_v58, %v944_v62  ;;  %v1492_v58 = vld [vmem:[%s5797_s4 + $0x18] sm:$0xff] }
 0x51f   :  { %4371 = vmatmul.mubr.msk.f32.vlgmr.msra.gmra.mrb[6].mxu1 %vm363_vm2, %v774_v60  ;;  %v4705_v59 = vpack.c.bf16 %v1492_v58, %v1491_v57 }
 0x520   :  { %4374 = vmatpush3.msra.mxu0 %v945_v63  ;;  %4379 = vmatpush3.msra.mxu1 %v950_v61 }
 0x521   :  { %4380 = vmatprep.mubr.msk.f32.mxu1 %vm5003_vm1, %v5002_v48  ;;  %4694 = vmatprep.subr.bf16.mxu0 %v4693_v26 }
 0x5ee   :  { %v1025_v0 = vpop.f32.mrb[4].mxu1 }
 0x5ef   :  { %v1105_v1 = vmul.f32 0.25, %v1025_v0  ;;  %v4367_v2 = vpop.f32.mrb[5].mxu1 }
 0x5f1   :  { %v1107_v3 = vsel %vm518_vm3, %v1105_v1, -inf }
 0x5f2   :  { %1108 = vmax.xlane.f32.xlu0 %v1107_v3  ;;  %v1101_v4 = vpop.f32.mrb[6].mxu1  ;;  %v3951_v3 = vld [vmem:[%s5800_s7 + $0x1] ss:$0 sm:$0xff] }
 0x5f3   :  { %v1106_v5 = vmul.f32 0.25, %v1101_v4  ;;  %v4372_v6 = vpop.f32.mrb[7].mxu1 }
 0x5f5   :  { %v1110_v7 = vsel %vm518_vm3, %v1106_v5, -inf }
 0x5f6   :  { %1111 = vmax.xlane.f32.xlu1 %v1110_v7  ;;  %v3952_v7 = vld [vmem:[%s5800_s7 + $0x2] ss:$0 sm:$0xff] }
 0x67f   :  { %v1109_v8 = vpop.xlane.xlu0 %1108 }
 0x680   :  { %v1113_v9 = vsub.f32 %v1105_v1, %v1109_v8 }
 0x682   :  { %v1115_v10 = vmul.f32 1.442695, %v1113_v9 }
 0x683   :  { %v1112_v11 = vpop.xlane.xlu1 %1111 }
 0x684   :  { %4896 = vpow2.f32 %v1115_v10  ;;  %v1114_v12 = vsub.f32 %v1106_v5, %v1112_v11 }
 0x686   :  { %v1117_v13 = vmul.f32 1.442695, %v1114_v12  ;;  %v1599_v12 = vld [vmem:[%s5799_s6] sm:$0xff] }
 0x688   :  { %4898 = vpow2.f32 %v1117_v13  ;;  %v1600_v13 = vld [vmem:[%s5799_s6 + $0x8] sm:$0xff] }
 0x68e   :  { %v4897_v14 = vpop.eup %4896 }
 0x68f   :  { %v1119_v15 = vsel %vm518_vm3, %v4897_v14, 0.0 }
 0x690   :  { %1120 = vadd.xlane.f32.xlu0 %v1119_v15  ;;  %v1601_v15 = vld [vmem:[%s5799_s6 + $0x10] sm:$0xff] }
 0x692   :  { %v4899_v16 = vpop.eup %4898 }
 0x693   :  { %v1122_v17 = vsel %vm518_vm3, %v4899_v16, 0.0 }
 0x694   :  { %1123 = vadd.xlane.f32.xlu1 %v1122_v17  ;;  %v1603_v17 = vld [vmem:[%s5799_s6 + $0x20] sm:$0xff] }
 0x71d   :  { %v1121_v18 = vpop.xlane.xlu0 %1120 }
 0x71e   :  { %4900 = vrcp.f32 %v1121_v18 }
 0x721   :  { %v1124_v19 = vpop.xlane.xlu1 %1123 }
 0x722   :  { %4902 = vrcp.f32 %v1124_v19  ;;  %v1604_v19 = vld [vmem:[%s5799_s6 + $0x28] sm:$0xff] }
 0x728   :  { %v4901_v20 = vpop.eup %4900 }
 0x729   :  { %v1127_v21 = vmul.f32 %v4901_v20, %v4897_v14  ;;  %v4709_v14 = vpack.c.bf16 %v1600_v13, %v1599_v12  ;;  %v4717_v20 = vpack.c.bf16 %v1604_v19, %v1603_v17  ;;  %v3979_v12 = vld [vmem:[%s5794_s1 + $0x150] sm:$0xff]  ;;  %v3980_v13 = vld [vmem:[%s5794_s1 + $0x158] sm:$0xff] }
 0x72b   :  { %4376 = vmatmul.mubr.msk.f32.vlgmr.msra.gmra.mrb[16].mxu0 %vm518_vm3, %v1127_v21  ;;  %v1605_v21 = vld [vmem:[%s5799_s6 + $0x30] sm:$0xff] }
 0x72c   :  { %v4903_v22 = vpop.eup %4902  ;;  %4696 = vmatpush3.bf16.msra.mxu0 %v4693_v26 }
 0x72d   :  { %v1128_v23 = vmul.f32 %v4903_v22, %v4899_v16  ;;  %4698 = vmatprep.subr.bf16.mxu0 %v4697_v29  ;;  %v1602_v16 = vld [vmem:[%s5799_s6 + $0x18] sm:$0xff] }
 0x72e   :  { %v4713_v18 = vpack.c.bf16 %v1602_v16, %v1601_v15  ;;  %v1606_v22 = vld [vmem:[%s5799_s6 + $0x38] sm:$0xff]  ;;  %v3969_v15 = vld [vmem:[%s5794_s1 + $0x100] sm:$0xff]  ;;  %v3970_v16 = vld [vmem:[%s5794_s1 + $0x108] sm:$0xff] }
 0x72f   :  { %4381 = vmatmul.mubr.msk.f32.vlgmr.msra.gmra.mrb[8].mxu1 %vm518_vm3, %v1128_v23  ;;  %v4721_v23 = vpack.c.bf16 %v1606_v22, %v1605_v21  ;;  %v4733_v17 = vpack.c.bf16 %v3970_v16, %v3969_v15  ;;  %v3995_v15 = vld [vmem:[%s5794_s1 + $0xf0] sm:$0xff]  ;;  %v3996_v16 = vld [vmem:[%s5794_s1 + $0xf8] sm:$0xff] }
 0x7fe   :  { %v1198_v30 = vpop.f32.mrb[16].mxu0 }
 0x7ff   :  { %v4377_v31 = vpop.f32.mrb[17].mxu0  ;;  %4387 = vmatprep.mubr.msk.f32.mxu0 %vm363_vm2, %v1198_v30 }
 0x802   :  { %v1271_v32 = vpop.f32.mrb[8].mxu1 }
 0x803   :  { %v4382_v33 = vpop.f32.mrb[9].mxu1  ;;  %4388 = vmatmul.mubr.msk.f32.vlgmr.msra.gmra.mrb[18].mxu0 %vm363_vm2, %v1271_v32 }
 0x804   :  { %4700 = vmatpush3.bf16.msra.mxu0 %v4697_v29  ;;  %4394 = vmatprep.mubr.msk.f32.mxu0 %vm363_vm2, %v5242_v44 }
 0x80b   :  { %4395 = vmatmul.mubr.msk.f32.vlgmr.msra.gmra.mrb[18].mxu0 %vm363_vm2, %v5244_v46 }
 0x8de   :  { %v4396_v36 = vpop.f32.mrb[18].mxu0 }
 0x8df   :  { %v1446_v37 = vadd.f32 %v4396_v36, %v3950_v34  ;;  %v1431_v38 = vpop.f32.mrb[19].mxu0 }
 0x8e0   :  { %v1445_v39 = vadd.f32 %v3950_v34, %v1431_v38 }
 0x8e1   :  { %v1448_v41 = vadd.f32 %v1446_v37, %v5133_v40 }
 0x8e2   :  { %v1447_v42 = vadd.f32 %v1445_v39, %v5123_v35  ;;  %v1489_v35 = vld [vmem:[%s5797_s4] sm:$0xff] }
 0x8e3   :  { %v1454_v43 = vsel %vm55_vm0, %v1448_v41, 0.0  ;;  %v4701_v56 = vpack.c.bf16 %v1490_v55, %v1489_v35 }
 0x8e4   :  { %1455 = vadd.xlane.f32.xlu1 %v1454_v43  ;;  %v1451_v44 = vsel %vm55_vm0, %v1447_v42, 0.0 }
 0x8e5   :  { %1452 = vadd.xlane.f32.xlu0 %v1451_v44  ;;  %4702 = vmatprep.subr.bf16.mxu0 %v4701_v56 }
 0x8e6   :  { %4704 = vmatpush3.bf16.msra.mxu0 %v4701_v56 }
 0x8e7   :  { %4706 = vmatprep.subr.bf16.mxu0 %v4705_v59 }
 0x8ea   :  { %4708 = vmatpush3.bf16.msra.mxu0 %v4705_v59 }
 0x8eb   :  { %4710 = vmatprep.subr.bf16.mxu0 %v4709_v14 }
 0x971   :  { %v1456_v45 = vpop.xlane.xlu1 %1455 }
 0x972   :  { %v1458_v46 = vmul.f32 0.03125, %v1456_v45  ;;  %v1453_v47 = vpop.xlane.xlu0 %1452 }
 0x973   :  { %v1457_v49 = vmul.f32 0.03125, %v1453_v47 }
 0x974   :  { %v1460_v50 = vsub.f32 %v1448_v41, %v1458_v46 }
 0x975   :  { %v1459_v51 = vsub.f32 %v1447_v42, %v1457_v49 }
 0x976   :  { %v1462_v52 = vmul.f32 %v1460_v50, %v1460_v50 }
 0x977   :  { %v1461_v53 = vmul.f32 %v1459_v51, %v1459_v51 }
 0x978   :  { %v1466_v54 = vsel %vm55_vm0, %v1462_v52, 0.0 }
 0x979   :  { %1467 = vadd.xlane.f32.xlu1 %v1466_v54  ;;  %v1463_v40 = vsel %vm55_vm0, %v1461_v53, 0.0 }
 0x97a   :  { %1464 = vadd.xlane.f32.xlu0 %v1463_v40 }
 0xa06   :  { %v1468_v60 = vpop.xlane.xlu1 %1467 }
 0xa07   :  { %v1470_v61 = vmul.f32 0.03125, %v1468_v60  ;;  %v1465_v62 = vpop.xlane.xlu0 %1464 }
 0xa08   :  { %v1469_v63 = vmul.f32 0.03125, %v1465_v62 }
 0xa09   :  { %v1472_v0 = vadd.f32 1e-12, %v1470_v61 }
 0xa0a   :  { %v1471_v1 = vadd.f32 1e-12, %v1469_v63 }
 0xa0b   :  { %4904 = vrsqrt.f32 %v1472_v0 }
 0xa0c   :  { %4906 = vrsqrt.f32 %v1471_v1 }
 0xa15   :  { %v4905_v2 = vpop.eup %4904 }
 0xa16   :  { %v4907_v4 = vpop.eup %4906  ;;  %v1476_v5 = vmul.f32 %v4905_v2, %v1460_v50  ;;  %v3956_v50 = vld [vmem:[%s5800_s7 + $0x3] ss:$0 sm:$0xff] }
 0xa17   :  { %v1475_v6 = vmul.f32 %v4907_v4, %v1459_v51  ;;  %v3962_v4 = vld [vmem:[%s5794_s1 + $0xc8] sm:$0xff] }
 0xa18   :  { %v1482_v8 = vmul.f32 %v3951_v3, %v1476_v5 }
 0xa19   :  { %v1481_v9 = vmul.f32 %v3951_v3, %v1475_v6  ;;  %v3961_v3 = vld [vmem:[%s5794_s1 + $0xc0] sm:$0xff] }
 0xa1a   :  { %v1488_v11 = vadd.f32 %v3952_v7, %v1482_v8  ;;  %v4725_v5 = vpack.c.bf16 %v3962_v4, %v3961_v3  ;;  %v3977_v6 = vld [vmem:[%s5794_s1 + $0x140] sm:$0xff] }
 0xa1b   :  { %v1487_v10 = vadd.f32 %v3952_v7, %v1481_v9  ;;  %v3978_v7 = vld [vmem:[%s5794_s1 + $0x148] sm:$0xff]  ;;  %v3963_v9 = vld [vmem:[%s5794_s1 + $0xd0] sm:$0xff] }
 0xa1c   :  { %v4741_v8 = vpack.c.bf16 %v3978_v7, %v3977_v6  ;;  %4726 = vmatprep.subr.bf16.mxu1 %v4725_v5  ;;  %v3993_v7 = vld [vmem:[%s5794_s1 + $0xe0] sm:$0xff] }
 0xa1d   :  { %4405 = vmatprep.mubr.msk.f32.mxu0 %vm55_vm0, %v1487_v10  ;;  %4728 = vmatpush3.bf16.msra.mxu1 %v4725_v5 }
 0xa1e   :  { %4406 = vmatmul.mubr.msk.f32.vlgmr.msra.gmra.mrb[20].mxu0 %vm55_vm0, %v1488_v11 }
 0xa1f   :  { %4712 = vmatpush3.bf16.msra.mxu0 %v4709_v14  ;;  %v4745_v14 = vpack.c.bf16 %v3980_v13, %v3979_v12 }
 0xa20   :  { %4714 = vmatprep.subr.bf16.mxu0 %v4713_v18 }
 0xa23   :  { %4716 = vmatpush3.bf16.msra.mxu0 %v4713_v18 }
 0xa24   :  { %4718 = vmatprep.subr.bf16.mxu0 %v4717_v20 }
 0xa27   :  { %4720 = vmatpush3.bf16.msra.mxu0 %v4717_v20 }
 0xa28   :  { %4722 = vmatprep.subr.bf16.mxu0 %v4721_v23 }
 0xa2b   :  { %4724 = vmatpush3.bf16.msra.mxu0 %v4721_v23 }
 0xa2c   :  { %4742 = vmatprep.subr.bf16.mxu0 %v4741_v8 }
 0xaf1   :  { %v4407_v25 = vpop.f32.mrb[20].mxu0 }
 0xaf2   :  { %v1578_v26 = vadd.f32 %v4407_v25, %v3953_v24  ;;  %v1572_v27 = vpop.f32.mrb[21].mxu0  ;;  %v3959_v25 = vld [vmem:[%s5800_s7 + $0x4] ss:$0 sm:$0xff] }
 0xaf3   :  { %v1573_v28 = vadd.f32 %v3953_v24, %v1572_v27 }
 0xaf4   :  { %v1584_v29 = vmul.f32 0.044715, %v1578_v26  ;;  %v1582_v46 = vmul.f32 0.5, %v1578_v26 }
 0xaf5   :  { %v1583_v30 = vmul.f32 0.044715, %v1573_v28  ;;  %v1581_v44 = vmul.f32 0.5, %v1573_v28 }
 0xaf6   :  { %v1586_v31 = vmul.f32 %v1584_v29, %v1578_v26  ;;  %v3960_v29 = vld [vmem:[%s5800_s7 + $0x5] ss:$0 sm:$0xff] }
 0xaf7   :  { %v1585_v32 = vmul.f32 %v1583_v30, %v1573_v28 }
 0xaf8   :  { %v1588_v33 = vmul.f32 %v1586_v31, %v1578_v26 }
 0xaf9   :  { %v1587_v34 = vmul.f32 %v1585_v32, %v1573_v28  ;;  %v3971_v32 = vld [vmem:[%s5794_s1 + $0x110] sm:$0xff] }
 0xafa   :  { %v1590_v36 = vadd.f32 %v1588_v33, %v1578_v26  ;;  %v3972_v33 = vld [vmem:[%s5794_s1 + $0x118] sm:$0xff] }
 0xafb   :  { %v1589_v37 = vadd.f32 %v1587_v34, %v1573_v28 }
 0xafc   :  { %v1592_v38 = vmul.f32 0.7978846, %v1590_v36 }
 0xafd   :  { %v1591_v39 = vmul.f32 0.7978846, %v1589_v37  ;;  %v4737_v37 = vpack.c.bf16 %v3972_v33, %v3971_v32 }
 0xafe   :  { %4908 = vtanh.f32 %v1592_v38  ;;  %v3982_v38 = vld [vmem:[%s5795_s2 + $0xa] ss:$0 sm:$0xff] }
 0xaff   :  { %4910 = vtanh.f32 %v1591_v39 }
 0xb08   :  { %v4909_v41 = vpop.eup %4908 }
 0xb09   :  { %v4911_v42 = vpop.eup %4910  ;;  %v1596_v43 = vadd.f32 1.0, %v4909_v41 }
 0xb0a   :  { %v1595_v45 = vadd.f32 1.0, %v4911_v42 }
 0xb0b   :  { %v1598_v49 = vmul.f32 %v1596_v43, %v1582_v46 }
 0xb0c   :  { %v1597_v47 = vmul.f32 %v1595_v45, %v1581_v44  ;;  %v3974_v45 = vld [vmem:[%s5795_s2 + $0x8] ss:$0 sm:$0xff] }
 0xb0e   :  { %4424 = vmatprep.mubr.msk.f32.mxu0 %vm1612_vm4, %v1597_v47 }
 0xb0f   :  { %4425 = vmatmul.mubr.msk.f32.vlgmr.msra.gmra.mrb[22].mxu0 %vm1612_vm4, %v1598_v49  ;;  %v3966_v49 = vld [vmem:[%s5795_s2 + $0x6] ss:$0 sm:$0xff] }
 0xb10   :  { %4744 = vmatpush3.bf16.msra.mxu0 %v4741_v8  ;;  %v3994_v8 = vld [vmem:[%s5794_s1 + $0xe8] sm:$0xff] }
 0xb11   :  { %4746 = vmatprep.subr.bf16.mxu0 %v4745_v14 }
 0xb14   :  { %4748 = vmatpush3.bf16.msra.mxu0 %v4745_v14 }
 0xb15   :  { %4470 = vmatprep.subr.mxu0 %v5002_v48 }
 0xbe2   :  { %v4426_v51 = vpop.f32.mrb[22].mxu0 }
 0xbe3   :  { %v1691_v52 = vadd.f32 %v4426_v51, %v3956_v50  ;;  %v1685_v53 = vpop.f32.mrb[23].mxu0 }
 0xbe4   :  { %v1686_v54 = vadd.f32 %v3956_v50, %v1685_v53 }
 0xbe5   :  { %v1695_v40 = vadd.f32 %v1691_v52, %v1488_v11 }
 0xbe6   :  { %v1694_v35 = vadd.f32 %v1686_v54, %v1487_v10  ;;  %v3964_v10 = vld [vmem:[%s5794_s1 + $0xd8] sm:$0xff] }
 0xbe7   :  { %v1701_v55 = vsel %vm55_vm0, %v1695_v40, 0.0  ;;  %v4729_v11 = vpack.c.bf16 %v3964_v10, %v3963_v9  ;;  %v4749_v9 = vpack.c.bf16 %v3994_v8, %v3993_v7  ;;  %v4001_v10 = vld [vmem:[%s5794_s1 + $0x120] sm:$0xff] }
 0xbe8   :  { %1702 = vadd.xlane.f32.xlu1 %v1701_v55  ;;  %v1698_v56 = vsel %vm55_vm0, %v1694_v35, 0.0 }
 0xbe9   :  { %1699 = vadd.xlane.f32.xlu0 %v1698_v56  ;;  %4730 = vmatprep.subr.bf16.mxu1 %v4729_v11 }
 0xbea   :  { %4732 = vmatpush3.bf16.msra.mxu1 %v4729_v11  ;;  %v4002_v11 = vld [vmem:[%s5794_s1 + $0x128] sm:$0xff] }
 0xbeb   :  { %4734 = vmatprep.subr.bf16.mxu1 %v4733_v17  ;;  %v4757_v12 = vpack.c.bf16 %v4002_v11, %v4001_v10 }
 0xc75   :  { %v1703_v57 = vpop.xlane.xlu1 %1702 }
 0xc76   :  { %v1705_v58 = vmul.f32 0.03125, %v1703_v57  ;;  %v1700_v59 = vpop.xlane.xlu0 %1699 }
 0xc77   :  { %v1704_v60 = vmul.f32 0.03125, %v1700_v59 }
 0xc78   :  { %v1707_v61 = vsub.f32 %v1695_v40, %v1705_v58 }
 0xc79   :  { %v1706_v62 = vsub.f32 %v1694_v35, %v1704_v60 }
 0xc7a   :  { %v1709_v63 = vmul.f32 %v1707_v61, %v1707_v61 }
 0xc7b   :  { %v1708_v0 = vmul.f32 %v1706_v62, %v1706_v62 }
 0xc7c   :  { %v1713_v1 = vsel %vm55_vm0, %v1709_v63, 0.0 }
 0xc7d   :  { %1714 = vadd.xlane.f32.xlu1 %v1713_v1  ;;  %v1710_v2 = vsel %vm55_vm0, %v1708_v0, 0.0 }
 0xc7e   :  { %1711 = vadd.xlane.f32.xlu0 %v1710_v2 }
 0xd0a   :  { %v1715_v18 = vpop.xlane.xlu1 %1714 }
 0xd0b   :  { %v1717_v19 = vmul.f32 0.03125, %v1715_v18  ;;  %v1712_v20 = vpop.xlane.xlu0 %1711 }
 0xd0c   :  { %v1716_v21 = vmul.f32 0.03125, %v1712_v20  ;;  %v4003_v20 = vld [vmem:[%s5794_s1 + $0x130] sm:$0xff] }
 0xd0d   :  { %v1719_v22 = vadd.f32 1e-12, %v1717_v19  ;;  %v4753_v19 = vpack.c.bf16 %v3996_v16, %v3995_v15  ;;  %v3991_v16 = vld [vmem:[%s5796_s3 + $0x20] sm:$0xff] }
 0xd0e   :  { %v1718_v23 = vadd.f32 1e-12, %v1716_v21  ;;  %v4004_v21 = vld [vmem:[%s5794_s1 + $0x138] sm:$0xff] }
 0xd0f   :  { %4912 = vrsqrt.f32 %v1719_v22  ;;  %v4009_v22 = vld [vmem:[%s5794_s1 + $0x160] sm:$0xff] }
 0xd10   :  { %4914 = vrsqrt.f32 %v1718_v23  ;;  %v4010_v23 = vld [vmem:[%s5794_s1 + $0x168] sm:$0xff] }
 0xd19   :  { %v4913_v24 = vpop.eup %4912 }
 0xd1a   :  { %v4915_v26 = vpop.eup %4914  ;;  %v1723_v27 = vmul.f32 %v4913_v24, %v1707_v61 }
 0xd1b   :  { %v1722_v28 = vmul.f32 %v4915_v26, %v1706_v62  ;;  %v4761_v26 = vpack.c.bf16 %v4004_v21, %v4003_v20 }
 0xd1c   :  { %v1729_v30 = vmul.f32 %v3959_v25, %v1723_v27  ;;  %v4765_v27 = vpack.c.bf16 %v4010_v23, %v4009_v22  ;;  %v4030_v23 = vld [vmem:[%s5800_s7 + $0x8] ss:$0 sm:$0xff] }
 0xd1d   :  { %v1728_v31 = vmul.f32 %v3959_v25, %v1722_v28  ;;  %v4011_v28 = vld [vmem:[%s5794_s1 + $0x170] sm:$0xff] }
 0xd1e   :  { %v5399_v36 = vadd.f32 %v3960_v29, %v1729_v30 }
 0xd1f   :  { %v5397_v34 = vadd.f32 %v3960_v29, %v1728_v31  ;;  %v4012_v29 = vld [vmem:[%s5794_s1 + $0x178] sm:$0xff] }
 0xd20   :  { %v4769_v30 = vpack.c.bf16 %v4012_v29, %v4011_v28 }
 0xd21   :  { %4435 = vmatprep.mubr.msk.f32.mxu1 %vm55_vm0, %v5397_v34  ;;  %4457 = vmatprep.mubr.msk.f32.mxu0 %vm55_vm0, %v5397_v34 }
 0xd22   :  { %4436 = vmatmul.mubr.msk.f32.vlgmr.msra.gmra.mrb[10].mxu1 %vm55_vm0, %v5399_v36  ;;  %4458 = vmatmul.mubr.msk.f32.vlgmr.msra.gmra.mrb[24].mxu0 %vm55_vm0, %v5399_v36 }
 0xd23   :  { %4736 = vmatpush3.bf16.msra.mxu1 %v4733_v17  ;;  %4446 = vmatprep.mubr.msk.f32.mxu1 %vm55_vm0, %v5397_v34 }
 0xd24   :  { %4738 = vmatprep.subr.bf16.mxu1 %v4737_v37  ;;  %4472 = vmatprep.mubr.msk.f32.mxu0 %vm5003_vm1, %v5002_v48 }
 0xd27   :  { %4740 = vmatpush3.bf16.msra.mxu1 %v4737_v37 }
 0xd28   :  { %4460 = vmatprep.subr.mxu1 %v5002_v48 }
 0xd2a   :  { %4447 = vmatmul.mubr.msk.f32.vlgmr.msra.gmra.mrb[12].mxu1 %vm55_vm0, %v5399_v36 }
 0xd2b   :  { %4462 = vmatprep.mubr.msk.f32.mxu1 %vm5003_vm1, %v5002_v48 }
 0xdf5   :  { %v4437_v39 = vpop.f32.mrb[10].mxu1  ;;  %v4459_v41 = vpop.f32.mrb[24].mxu0 }
 0xdf6   :  { %v1821_v42 = vpop.f32.mrb[11].mxu1  ;;  %v1997_v43 = vpop.f32.mrb[25].mxu0  ;;  %v1827_v53 = vadd.f32 %v4437_v39, %v3966_v49  ;;  %v2003_v54 = vadd.f32 %v4459_v41, %v3982_v38  ;;  %v4006_v41 = vld [vmem:[%s5795_s2 + $0x9] ss:$0 sm:$0xff] }
 0xdf7   :  { %v1998_v44 = vadd.f32 %v3982_v38, %v1997_v43  ;;  %v1822_v51 = vadd.f32 %v3966_v49, %v1821_v42 }
 0xdf9   :  { %4471 = vmatpush3.msra.mxu0 %v1998_v44  ;;  %v3998_v44 = vld [vmem:[%s5795_s2 + $0x7] ss:$0 sm:$0xff] }
 0xdfa   :  { %4750 = vmatprep.subr.bf16.mxu0 %v4749_v9 }
 0xdfd   :  { %v4448_v46 = vpop.f32.mrb[12].mxu1 }
 0xdfe   :  { %v1909_v47 = vpop.f32.mrb[13].mxu1  ;;  %v1915_v52 = vadd.f32 %v4448_v46, %v3974_v45  ;;  %v4014_v46 = vld [vmem:[%s5795_s2 + $0xb] ss:$0 sm:$0xff]  ;;  %s4954_s2 = scalar_lea.vmem %s3876_s29, 32 }
 0xdff   :  { %v1910_v50 = vadd.f32 %v3974_v45, %v1909_v47  ;;  %p4955_p0 = scmp.ne.s32.totalorder %s3876_s29, %s4954_s2  ;;  %p4960_p2 = scmp.lt.s32.totalorder %s4954_s2, %s4954_s2 }
 0xe01   :  { %4461 = vmatpush3.xpose.msk.msra.mxu1 %vm363_vm2, %v1910_v50  ;;  %p4961_p3 = por %p4960_p2, %p4959_p1 }
 0xe02   :  { %4465 = vmatprep.subr.mxu1 %v5002_v48 }
 0xe03   :  { %p4962_p4 = pnand %p4961_p3, %p4955_p0 }
 0xe04   :  { %4463 = vmatmul.mubr.msk.f32.vlgmr.msra.gmra.mrb[14].mxu1 %vm363_vm2, %v1822_v51 }
 0xe05   :  { %4466 = vmatpush3.xpose.msk.msra.mxu1 %vm363_vm2, %v1915_v52  ;;  %4467 = vmatprep.mubr.msk.f32.mxu1 %vm5003_vm1, %v5002_v48 }
 0xe06   :  { %4475 = vmatprep.subr.mxu1 %v5002_v48 }
 0xe08   :  { %4468 = vmatmul.mubr.msk.f32.vlgmr.msra.gmra.mrb[16].mxu1 %vm363_vm2, %v1827_v53 }
 0xe09   :  { %4476 = vmatpush3.msra.mxu1 %v2003_v54  ;;  %4477 = vmatprep.mubr.msk.f32.mxu1 %vm5003_vm1, %v5002_v48 }
 0xe0a   :  { %4758 = vmatprep.subr.bf16.mxu1 %v4757_v12 }
 0xed7   :  { %v2078_v40 = vpop.f32.mrb[14].mxu1 }
 0xed8   :  { %v2158_v35 = vmul.f32 0.25, %v2078_v40  ;;  %v4464_v55 = vpop.f32.mrb[15].mxu1 }
 0xeda   :  { %v2160_v56 = vsel %vm518_vm3, %v2158_v35, -inf }
 0xedb   :  { %2161 = vmax.xlane.f32.xlu1 %v2160_v56  ;;  %v2154_v57 = vpop.f32.mrb[16].mxu1 }
 0xedc   :  { %v2159_v58 = vmul.f32 0.25, %v2154_v57  ;;  %v4469_v59 = vpop.f32.mrb[17].mxu1 }
 0xede   :  { %v2163_v60 = vsel %vm518_vm3, %v2159_v58, -inf }
 0xedf   :  { %2164 = vmax.xlane.f32.xlu0 %v2163_v60 }
 0xf68   :  { %v2162_v61 = vpop.xlane.xlu1 %2161 }
 0xf69   :  { %v2166_v62 = vsub.f32 %v2158_v35, %v2162_v61 }
 0xf6b   :  { %v2168_v63 = vmul.f32 1.442695, %v2166_v62 }
 0xf6c   :  { %v2165_v0 = vpop.xlane.xlu0 %2164 }
 0xf6d   :  { %4916 = vpow2.f32 %v2168_v63  ;;  %v2167_v1 = vsub.f32 %v2159_v58, %v2165_v0 }
 0xf6f   :  { %v2170_v2 = vmul.f32 1.442695, %v2167_v1 }
 0xf71   :  { %4918 = vpow2.f32 %v2170_v2 }
 0xf77   :  { %v4917_v3 = vpop.eup %4916 }
 0xf78   :  { %v2172_v4 = vsel %vm518_vm3, %v4917_v3, 0.0 }
 0xf79   :  { %2173 = vadd.xlane.f32.xlu1 %v2172_v4 }
 0xf7b   :  { %v4919_v5 = vpop.eup %4918 }
 0xf7c   :  { %v2175_v6 = vsel %vm518_vm3, %v4919_v5, 0.0 }
 0xf7d   :  { %2176 = vadd.xlane.f32.xlu0 %v2175_v6 }
0x1006   :  { %v2174_v13 = vpop.xlane.xlu1 %2173 }
0x1007   :  { %4920 = vrcp.f32 %v2174_v13  ;;  %v4023_v13 = vld [vmem:[%s5796_s3 + $0x30] sm:$0xff] }
0x100a   :  { %v2177_v14 = vpop.xlane.xlu0 %2176 }
0x100b   :  { %4922 = vrcp.f32 %v2177_v14  ;;  %v4024_v14 = vld [vmem:[%s5796_s3 + $0x38] sm:$0xff] }
0x100c   :  { %v4773_v15 = vpack.c.bf16 %v4024_v14, %v4023_v13  ;;  %v4040_v13 = vld [vmem:[%s5798_s5 + $0x1] ss:$0 sm:$0xff] }
0x1011   :  { %v4921_v17 = vpop.eup %4920 }
0x1012   :  { %v2180_v18 = vmul.f32 %v4921_v17, %v4917_v3  ;;  %v3992_v17 = vld [vmem:[%s5796_s3 + $0x28] sm:$0xff] }
0x1014   :  { %4473 = vmatmul.mubr.msk.f32.vlgmr.msra.gmra.mrb[26].mxu0 %vm518_vm3, %v2180_v18  ;;  %v4777_v18 = vpack.c.bf16 %v3992_v17, %v3991_v16 }
0x1015   :  { %v4923_v24 = vpop.eup %4922  ;;  %4752 = vmatpush3.bf16.msra.mxu0 %v4749_v9  ;;  %4488 = vmatprep.mubr.msk.f32.mxu0 %vm55_vm0, %v5397_v34 }
0x1016   :  { %v2181_v25 = vmul.f32 %v4923_v24, %v4919_v5  ;;  %4754 = vmatprep.subr.bf16.mxu0 %v4753_v19 }
0x1018   :  { %4478 = vmatmul.mubr.msk.f32.vlgmr.msra.gmra.mrb[18].mxu1 %vm518_vm3, %v2181_v25 }
0x1019   :  { %4756 = vmatpush3.bf16.msra.mxu0 %v4753_v19  ;;  %4760 = vmatpush3.bf16.msra.mxu1 %v4757_v12 }
0x101a   :  { %4499 = vmatprep.mubr.msk.f32.mxu1 %vm55_vm0, %v5397_v34  ;;  %4762 = vmatprep.subr.bf16.mxu1 %v4761_v26 }
0x101b   :  { %4766 = vmatprep.subr.bf16.mxu0 %v4765_v27 }
0x101c   :  { %4489 = vmatmul.mubr.msk.f32.vlgmr.msra.gmra.mrb[28].mxu0 %vm55_vm0, %v5399_v36 }
0x101d   :  { %4764 = vmatpush3.bf16.msra.mxu1 %v4761_v26  ;;  %4768 = vmatpush3.bf16.msra.mxu0 %v4765_v27 }
0x101e   :  { %4510 = vmatprep.mubr.msk.f32.mxu0 %vm55_vm0, %v5397_v34  ;;  %4770 = vmatprep.subr.bf16.mxu0 %v4769_v30 }
0x101f   :  { %4513 = vmatprep.subr.mxu1 %v5002_v48 }
0x1020   :  { %4500 = vmatmul.mubr.msk.f32.vlgmr.msra.gmra.mrb[20].mxu1 %vm55_vm0, %v5399_v36 }
0x1021   :  { %4772 = vmatpush3.bf16.msra.mxu0 %v4769_v30  ;;  %4515 = vmatprep.mubr.msk.f32.mxu1 %vm5003_vm1, %v5002_v48 }
0x1022   :  { %4523 = vmatprep.subr.mxu0 %v5002_v48 }
0x1024   :  { %4511 = vmatmul.mubr.msk.f32.vlgmr.msra.gmra.mrb[30].mxu0 %vm55_vm0, %v5399_v36 }
0x1025   :  { %4525 = vmatprep.mubr.msk.f32.mxu0 %vm5003_vm1, %v5002_v48 }
0x10e7   :  { %v5497_v31 = vpop.f32.mrb[26].mxu0 }
0x10e8   :  { %v4474_v32 = vpop.f32.mrb[27].mxu0 }
0x10eb   :  { %v5499_v33 = vpop.f32.mrb[18].mxu1 }
0x10ec   :  { %v4479_v37 = vpop.f32.mrb[19].mxu1 }
0x10ef   :  { %v4490_v38 = vpop.f32.mrb[28].mxu0 }
0x10f0   :  { %v2410_v39 = vpop.f32.mrb[29].mxu0  ;;  %v2416_v53 = vadd.f32 %v4490_v38, %v3998_v44 }
0x10f1   :  { %v2411_v49 = vadd.f32 %v3998_v44, %v2410_v39 }
0x10f3   :  { %v4501_v42 = vpop.f32.mrb[20].mxu1 }
0x10f4   :  { %v2498_v43 = vpop.f32.mrb[21].mxu1  ;;  %v2504_v51 = vadd.f32 %v4501_v42, %v4006_v41 }
0x10f5   :  { %v2499_v45 = vadd.f32 %v4006_v41, %v2498_v43 }
0x10f7   :  { %v4512_v47 = vpop.f32.mrb[30].mxu0  ;;  %4514 = vmatpush3.xpose.msk.msra.mxu1 %vm363_vm2, %v2499_v45  ;;  %v4036_v45 = vld [vmem:[%s5797_s4 + $0x28] sm:$0xff] }
0x10f8   :  { %v2586_v50 = vpop.f32.mrb[31].mxu0  ;;  %4518 = vmatprep.subr.mxu1 %v5002_v48  ;;  %v2592_v54 = vadd.f32 %v4512_v47, %v4014_v46  ;;  %v4037_v47 = vld [vmem:[%s5797_s4 + $0x30] sm:$0xff] }
0x10f9   :  { %v2587_v52 = vadd.f32 %v4014_v46, %v2586_v50 }
0x10fa   :  { %4516 = vmatmul.mubr.msk.f32.vlgmr.msra.gmra.mrb[22].mxu1 %vm363_vm2, %v2411_v49  ;;  %v4038_v49 = vld [vmem:[%s5797_s4 + $0x38] sm:$0xff] }
0x10fb   :  { %4519 = vmatpush3.xpose.msk.msra.mxu1 %vm363_vm2, %v2504_v51  ;;  %4524 = vmatpush3.msra.mxu0 %v2587_v52  ;;  %v4785_v50 = vpack.c.bf16 %v4038_v49, %v4037_v47 }
0x10fc   :  { %4520 = vmatprep.mubr.msk.f32.mxu1 %vm5003_vm1, %v5002_v48  ;;  %4528 = vmatprep.subr.mxu1 %v5002_v48 }
0x10fd   :  { %4774 = vmatprep.subr.bf16.mxu0 %v4773_v15 }
0x10fe   :  { %4521 = vmatmul.mubr.msk.f32.vlgmr.msra.gmra.mrb[24].mxu1 %vm363_vm2, %v2416_v53 }
0x10ff   :  { %4529 = vmatpush3.msra.mxu1 %v2592_v54  ;;  %4530 = vmatprep.mubr.msk.f32.mxu1 %vm5003_vm1, %v5002_v48 }
0x11cd   :  { %v2667_v40 = vpop.f32.mrb[22].mxu1 }
0x11ce   :  { %v2747_v35 = vmul.f32 0.25, %v2667_v40  ;;  %v4517_v55 = vpop.f32.mrb[23].mxu1 }
0x11d0   :  { %v2749_v56 = vsel %vm518_vm3, %v2747_v35, -inf }
0x11d1   :  { %2750 = vmax.xlane.f32.xlu0 %v2749_v56  ;;  %v2743_v57 = vpop.f32.mrb[24].mxu1  ;;  %v4033_v56 = vld [vmem:[%s5800_s7 + $0x9] ss:$0 sm:$0xff] }
0x11d2   :  { %v2748_v58 = vmul.f32 0.25, %v2743_v57  ;;  %v4522_v59 = vpop.f32.mrb[25].mxu1 }
0x11d4   :  { %v2752_v60 = vsel %vm518_vm3, %v2748_v58, -inf }
0x11d5   :  { %2753 = vmax.xlane.f32.xlu1 %v2752_v60  ;;  %v4034_v60 = vld [vmem:[%s5800_s7 + $0xa] ss:$0 sm:$0xff] }
0x125e   :  { %v2751_v61 = vpop.xlane.xlu0 %2750 }
0x125f   :  { %v2755_v62 = vsub.f32 %v2747_v35, %v2751_v61 }
0x1261   :  { %v2757_v63 = vmul.f32 1.442695, %v2755_v62 }
0x1262   :  { %v2754_v0 = vpop.xlane.xlu1 %2753 }
0x1263   :  { %4924 = vpow2.f32 %v2757_v63  ;;  %v2756_v1 = vsub.f32 %v2748_v58, %v2754_v0 }
0x1265   :  { %v2759_v2 = vmul.f32 1.442695, %v2756_v1  ;;  %v4043_v1 = vld [vmem:[%s5799_s6 + $0x40] sm:$0xff] }
0x1267   :  { %4926 = vpow2.f32 %v2759_v2  ;;  %v4044_v2 = vld [vmem:[%s5799_s6 + $0x48] sm:$0xff] }
0x126d   :  { %v4925_v3 = vpop.eup %4924 }
0x126e   :  { %v2761_v4 = vsel %vm518_vm3, %v4925_v3, 0.0 }
0x126f   :  { %2762 = vadd.xlane.f32.xlu0 %v2761_v4  ;;  %v4045_v4 = vld [vmem:[%s5799_s6 + $0x50] sm:$0xff] }
0x1271   :  { %v4927_v5 = vpop.eup %4926 }
0x1272   :  { %v2764_v6 = vsel %vm518_vm3, %v4927_v5, 0.0 }
0x1273   :  { %2765 = vadd.xlane.f32.xlu1 %v2764_v6 }
0x12fc   :  { %v2763_v7 = vpop.xlane.xlu0 %2762 }
0x12fd   :  { %4928 = vrcp.f32 %v2763_v7  ;;  %v4047_v7 = vld [vmem:[%s5799_s6 + $0x60] sm:$0xff] }
0x1300   :  { %v2766_v8 = vpop.xlane.xlu1 %2765 }
0x1301   :  { %4930 = vrcp.f32 %v2766_v8  ;;  %v4048_v8 = vld [vmem:[%s5799_s6 + $0x68] sm:$0xff] }
0x1307   :  { %v4929_v9 = vpop.eup %4928 }
0x1308   :  { %v2769_v10 = vmul.f32 %v4929_v9, %v4925_v3  ;;  %v4789_v3 = vpack.c.bf16 %v4044_v2, %v4043_v1  ;;  %v4797_v9 = vpack.c.bf16 %v4048_v8, %v4047_v7  ;;  %v3388_v1 = vld [vmem:[%s5802_s9 + $0x10] sm:$0xff]  ;;  %v3389_v2 = vld [vmem:[%s5802_s9 + $0x18] sm:$0xff] }
0x130a   :  { %4526 = vmatmul.mubr.msk.f32.vlgmr.msra.gmra.mrb[32].mxu0 %vm518_vm3, %v2769_v10  ;;  %v4049_v10 = vld [vmem:[%s5799_s6 + $0x70] sm:$0xff] }
0x130b   :  { %v4931_v11 = vpop.eup %4930  ;;  %4776 = vmatpush3.bf16.msra.mxu0 %v4773_v15 }
0x130c   :  { %v2770_v12 = vmul.f32 %v4931_v11, %v4927_v5  ;;  %4778 = vmatprep.subr.bf16.mxu0 %v4777_v18  ;;  %v4046_v5 = vld [vmem:[%s5799_s6 + $0x58] sm:$0xff] }
0x130d   :  { %v4793_v6 = vpack.c.bf16 %v4046_v5, %v4045_v4  ;;  %v4050_v11 = vld [vmem:[%s5799_s6 + $0x78] sm:$0xff]  ;;  %v4809_v4 = vpack.c.bf16 %v3389_v2, %v3388_v1  ;;  %v3707_v2 = vld [vmem:[%s5803_s10 + $0x20] sm:$0xff] }
0x130e   :  { %4531 = vmatmul.mubr.msk.f32.vlgmr.msra.gmra.mrb[26].mxu1 %vm518_vm3, %v2770_v12  ;;  %v4801_v12 = vpack.c.bf16 %v4050_v11, %v4049_v10 }
0x13dd   :  { %v2840_v19 = vpop.f32.mrb[32].mxu0 }
0x13de   :  { %v4527_v20 = vpop.f32.mrb[33].mxu0  ;;  %4537 = vmatprep.mubr.msk.f32.mxu0 %vm363_vm2, %v2840_v19 }
0x13e1   :  { %v2913_v21 = vpop.f32.mrb[26].mxu1 }
0x13e2   :  { %v4532_v22 = vpop.f32.mrb[27].mxu1  ;;  %4538 = vmatmul.mubr.msk.f32.vlgmr.msra.gmra.mrb[34].mxu0 %vm363_vm2, %v2913_v21 }
0x13e3   :  { %4780 = vmatpush3.bf16.msra.mxu0 %v4777_v18  ;;  %4544 = vmatprep.mubr.msk.f32.mxu0 %vm363_vm2, %v5497_v31 }
0x13e4   :  { %4790 = vmatprep.subr.bf16.mxu0 %v4789_v3 }
0x13ea   :  { %4545 = vmatmul.mubr.msk.f32.vlgmr.msra.gmra.mrb[34].mxu0 %vm363_vm2, %v5499_v33 }
0x13eb   :  { %4792 = vmatpush3.bf16.msra.mxu0 %v4789_v3 }
0x13ec   :  { %4794 = vmatprep.subr.bf16.mxu0 %v4793_v6 }
0x13ef   :  { %4796 = vmatpush3.bf16.msra.mxu0 %v4793_v6 }
0x13f0   :  { %4798 = vmatprep.subr.bf16.mxu0 %v4797_v9 }
0x13f3   :  { %4800 = vmatpush3.bf16.msra.mxu0 %v4797_v9 }
0x13f4   :  { %4802 = vmatprep.subr.bf16.mxu0 %v4801_v12 }
0x13f7   :  { %4804 = vmatpush3.bf16.msra.mxu0 %v4801_v12  ;;  %v4057_v12 = vld [vmem:[%s5800_s7 + $0xc] ss:$0 sm:$0xff] }
0x14bd   :  { %v4546_v24 = vpop.f32.mrb[34].mxu0 }
0x14be   :  { %v3089_v25 = vadd.f32 %v4546_v24, %v4030_v23  ;;  %v3073_v26 = vpop.f32.mrb[35].mxu0 }
0x14bf   :  { %v3088_v27 = vadd.f32 %v4030_v23, %v3073_v26 }
0x14c0   :  { %v3091_v28 = vadd.f32 %v3089_v25, %v5399_v36 }
0x14c1   :  { %v3090_v29 = vadd.f32 %v3088_v27, %v5397_v34  ;;  %v4035_v34 = vld [vmem:[%s5797_s4 + $0x20] sm:$0xff] }
0x14c2   :  { %v3097_v30 = vsel %vm55_vm0, %v3091_v28, 0.0  ;;  %v4781_v46 = vpack.c.bf16 %v4036_v45, %v4035_v34 }
0x14c3   :  { %3098 = vadd.xlane.f32.xlu1 %v3097_v30  ;;  %v3094_v31 = vsel %vm55_vm0, %v3090_v29, 0.0 }
0x14c4   :  { %3095 = vadd.xlane.f32.xlu0 %v3094_v31  ;;  %4782 = vmatprep.subr.bf16.mxu1 %v4781_v46 }
0x14c5   :  { %4784 = vmatpush3.bf16.msra.mxu1 %v4781_v46 }
0x14c6   :  { %4786 = vmatprep.subr.bf16.mxu1 %v4785_v50 }
0x14c9   :  { %4788 = vmatpush3.bf16.msra.mxu1 %v4785_v50 }
0x1550   :  { %v3099_v32 = vpop.xlane.xlu1 %3098 }
0x1551   :  { %v3101_v33 = vmul.f32 0.03125, %v3099_v32  ;;  %v3096_v37 = vpop.xlane.xlu0 %3095 }
0x1552   :  { %v3100_v38 = vmul.f32 0.03125, %v3096_v37 }
0x1553   :  { %v3103_v39 = vsub.f32 %v3091_v28, %v3101_v33 }
0x1554   :  { %v3102_v41 = vsub.f32 %v3090_v29, %v3100_v38 }
0x1555   :  { %v3105_v42 = vmul.f32 %v3103_v39, %v3103_v39 }
0x1556   :  { %v3104_v43 = vmul.f32 %v3102_v41, %v3102_v41 }
0x1557   :  { %v3109_v44 = vsel %vm55_vm0, %v3105_v42, 0.0 }
0x1558   :  { %3110 = vadd.xlane.f32.xlu1 %v3109_v44  ;;  %v3106_v36 = vsel %vm55_vm0, %v3104_v43, 0.0 }
0x1559   :  { %3107 = vadd.xlane.f32.xlu0 %v3106_v36 }
0x15e5   :  { %v3111_v51 = vpop.xlane.xlu1 %3110 }
0x15e6   :  { %v3113_v52 = vmul.f32 0.03125, %v3111_v51  ;;  %v3108_v53 = vpop.xlane.xlu0 %3107 }
0x15e7   :  { %v3112_v54 = vmul.f32 0.03125, %v3108_v53 }
0x15e8   :  { %v3115_v40 = vadd.f32 1e-12, %v3113_v52 }
0x15e9   :  { %v3114_v35 = vadd.f32 1e-12, %v3112_v54 }
0x15ea   :  { %4932 = vrsqrt.f32 %v3115_v40 }
0x15eb   :  { %4934 = vrsqrt.f32 %v3114_v35 }
0x15f4   :  { %v4933_v55 = vpop.eup %4932 }
0x15f5   :  { %v4935_v57 = vpop.eup %4934  ;;  %v3119_v58 = vmul.f32 %v4933_v55, %v3103_v39  ;;  %v4052_v39 = vld [vmem:[%s5800_s7 + $0xb] ss:$0 sm:$0xff] }
0x15f6   :  { %v3118_v59 = vmul.f32 %v4935_v57, %v3102_v41  ;;  %v4064_v57 = vld [vmem:[%s5802_s9 + $0x28] sm:$0xff] }
0x15f7   :  { %v3125_v61 = vmul.f32 %v4033_v56, %v3119_v58 }
0x15f8   :  { %v3124_v62 = vmul.f32 %v4033_v56, %v3118_v59  ;;  %v4063_v56 = vld [vmem:[%s5802_s9 + $0x20] sm:$0xff] }
0x15f9   :  { %v3131_v0 = vadd.f32 %v4034_v60, %v3125_v61  ;;  %v4817_v58 = vpack.c.bf16 %v4064_v57, %v4063_v56  ;;  %v3386_v59 = vld [vmem:[%s5802_s9] sm:$0xff]  ;;  %v4065_v61 = vld [vmem:[%s5802_s9 + $0x30] sm:$0xff] }
0x15fa   :  { %v3130_v63 = vadd.f32 %v4034_v60, %v3124_v62  ;;  %v3387_v60 = vld [vmem:[%s5802_s9 + $0x8] sm:$0xff]  ;;  %v5004_v62 = vmov 0.0|0.0  }
0x15fb   :  { %4818 = vmatprep.subr.bf16.mxu0 %v4817_v58  ;;  %4805 = vmatprep.subr.bf16.mxu1 %v5004_v62 }
0x15fc   :  { %4555 = vmatprep.mubr.msk.f32.mxu1 %vm55_vm0, %v3130_v63 }
0x15fd   :  { %4556 = vmatmul.mubr.msk.f32.vlgmr.msra.gmra.mrb[28].mxu1 %vm55_vm0, %v3131_v0 }
0x15fe   :  { %4585 = vmatprep.mubr.msk.f32.mxu1 %vm5003_vm1, %v5002_v48 }
0x16d0   :  { %v4557_v14 = vpop.f32.mrb[28].mxu1 }
0x16d1   :  { %v3223_v15 = vadd.f32 %v4557_v14, %v4040_v13  ;;  %v3217_v16 = vpop.f32.mrb[29].mxu1 }
0x16d2   :  { %v3218_v17 = vadd.f32 %v4040_v13, %v3217_v16 }
0x16d3   :  { %v3229_v18 = vmul.f32 0.044715, %v3223_v15  ;;  %v3227_v33 = vmul.f32 0.5, %v3223_v15 }
0x16d4   :  { %v3228_v19 = vmul.f32 0.044715, %v3218_v17  ;;  %v3226_v31 = vmul.f32 0.5, %v3218_v17 }
0x16d5   :  { %v3231_v20 = vmul.f32 %v3229_v18, %v3223_v15 }
0x16d6   :  { %v3230_v21 = vmul.f32 %v3228_v19, %v3218_v17 }
0x16d7   :  { %v3233_v22 = vmul.f32 %v3231_v20, %v3223_v15 }
0x16d8   :  { %v3232_v23 = vmul.f32 %v3230_v21, %v3218_v17 }
0x16d9   :  { %v3235_v24 = vadd.f32 %v3233_v22, %v3223_v15  ;;  %v4058_v15 = vld [vmem:[%s5800_s7 + $0xd] ss:$0 sm:$0xff] }
0x16da   :  { %v3234_v25 = vadd.f32 %v3232_v23, %v3218_v17  ;;  %v3469_v23 = vld [vmem:[%s5805_s12] sm:$0xff] }
0x16db   :  { %v3237_v26 = vmul.f32 0.7978846, %v3235_v24  ;;  %v3470_v24 = vld [vmem:[%s5805_s12 + $0x8] sm:$0xff] }
0x16dc   :  { %v3236_v27 = vmul.f32 0.7978846, %v3234_v25  ;;  %v3471_v25 = vld [vmem:[%s5805_s12 + $0x10] sm:$0xff] }
0x16dd   :  { %4936 = vtanh.f32 %v3237_v26  ;;  %v4812_v26 = vpack.c.bf16 %v3470_v24, %v3469_v23  ;;  %v3715_v24 = vld [vmem:[%s5803_s10 + $0x60] sm:$0xff] }
0x16de   :  { %4938 = vtanh.f32 %v3236_v27  ;;  %v3472_v27 = vld [vmem:[%s5805_s12 + $0x18] sm:$0xff] }
0x16e7   :  { %v4937_v28 = vpop.eup %4936 }
0x16e8   :  { %v4939_v29 = vpop.eup %4938  ;;  %v3241_v30 = vadd.f32 1.0, %v4937_v28  ;;  %v4815_v28 = vpack.c.bf16 %v3472_v27, %v3471_v25  ;;  %v3716_v25 = vld [vmem:[%s5803_s10 + $0x68] sm:$0xff]  ;;  %v3717_v27 = vld [vmem:[%s5803_s10 + $0x70] sm:$0xff] }
0x16e9   :  { %v3240_v32 = vadd.f32 1.0, %v4939_v29  ;;  %v4059_v29 = vld [vmem:[%s5801_s8 + $0x2] ss:$0 sm:$0xff] }
0x16ea   :  { %v3243_v38 = vmul.f32 %v3241_v30, %v3227_v33 }
0x16eb   :  { %v3242_v37 = vmul.f32 %v3240_v32, %v3226_v31 }
0x16ed   :  { %4574 = vmatprep.mubr.msk.f32.mxu0 %vm1612_vm4, %v3242_v37 }
0x16ee   :  { %4575 = vmatmul.mubr.msk.f32.vlgmr.msra.gmra.mrb[36].mxu0 %vm1612_vm4, %v3243_v38 }
0x16ef   :  { %4820 = vmatpush3.bf16.msra.mxu0 %v4817_v58 }
0x17c1   :  { %v4576_v41 = vpop.f32.mrb[36].mxu0 }
0x17c2   :  { %v3336_v42 = vadd.f32 %v4576_v41, %v4052_v39  ;;  %v3330_v43 = vpop.f32.mrb[37].mxu0 }
0x17c3   :  { %v3331_v44 = vadd.f32 %v4052_v39, %v3330_v43 }
0x17c4   :  { %v3340_v36 = vadd.f32 %v3336_v42, %v3131_v0  ;;  %v4066_v0 = vld [vmem:[%s5802_s9 + $0x38] sm:$0xff] }
0x17c5   :  { %v3339_v34 = vadd.f32 %v3331_v44, %v3130_v63  ;;  %v4806_v63 = vpack.c.bf16 %v3387_v60, %v3386_v59  ;;  %v4821_v3 = vpack.c.bf16 %v4066_v0, %v4065_v61  ;;  %v3703_v59 = vld [vmem:[%s5803_s10] sm:$0xff]  ;;  %v3704_v60 = vld [vmem:[%s5803_s10 + $0x8] sm:$0xff]  ;;  %v3706_v0 = vld [vmem:[%s5803_s10 + $0x18] sm:$0xff] }
0x17c6   :  { %v3346_v45 = vsel %vm55_vm0, %v3340_v36, 0.0 }
0x17c7   :  { %3347 = vadd.xlane.f32.xlu1 %v3346_v45  ;;  %v3343_v46 = vsel %vm55_vm0, %v3339_v34, 0.0  ;;  %4807 = vmatpush3.bf16.msra.mxu1 %v4806_v63  ;;  %v3705_v63 = vld [vmem:[%s5803_s10 + $0x10] sm:$0xff] }
0x17c8   :  { %3344 = vadd.xlane.f32.xlu0 %v3343_v46  ;;  %4822 = vmatprep.subr.bf16.mxu0 %v4821_v3  ;;  %v4831_v1 = vpack.c.bf16 %v3706_v0, %v3705_v63 }
0x17c9   :  { %4808 = vmatprep.subr.bf16.mxu1 %v5004_v62  ;;  %4824 = vmatpush3.bf16.msra.mxu0 %v4821_v3  ;;  %v3708_v3 = vld [vmem:[%s5803_s10 + $0x28] sm:$0xff] }
0x17cb   :  { %4810 = vmatpush3.bf16.msra.mxu1 %v4809_v4  ;;  %v4837_v4 = vpack.c.bf16 %v3708_v3, %v3707_v2 }
0x17cc   :  { %4811 = vmatprep.subr.bf16.mxu1 %v5004_v62 }
0x1854   :  { %v3348_v47 = vpop.xlane.xlu1 %3347 }
0x1855   :  { %v3350_v49 = vmul.f32 0.03125, %v3348_v47  ;;  %v3345_v50 = vpop.xlane.xlu0 %3344 }
0x1856   :  { %v3349_v51 = vmul.f32 0.03125, %v3345_v50 }
0x1857   :  { %v3352_v52 = vsub.f32 %v3340_v36, %v3350_v49 }
0x1858   :  { %v3351_v53 = vsub.f32 %v3339_v34, %v3349_v51 }
0x1859   :  { %v3354_v54 = vmul.f32 %v3352_v52, %v3352_v52 }
0x185a   :  { %v3353_v40 = vmul.f32 %v3351_v53, %v3351_v53 }
0x185b   :  { %v3358_v35 = vsel %vm55_vm0, %v3354_v54, 0.0 }
0x185c   :  { %3359 = vadd.xlane.f32.xlu1 %v3358_v35  ;;  %v3355_v55 = vsel %vm55_vm0, %v3353_v40, 0.0 }
0x185d   :  { %3356 = vadd.xlane.f32.xlu0 %v3355_v55 }
0x18e9   :  { %v3360_v5 = vpop.xlane.xlu1 %3359 }
0x18ea   :  { %v3362_v6 = vmul.f32 0.03125, %v3360_v5  ;;  %v3357_v7 = vpop.xlane.xlu0 %3356  ;;  %v3709_v5 = vld [vmem:[%s5803_s10 + $0x30] sm:$0xff] }
0x18eb   :  { %v3361_v8 = vmul.f32 0.03125, %v3357_v7 }
0x18ec   :  { %v3364_v9 = vadd.f32 1e-12, %v3362_v6  ;;  %v3710_v6 = vld [vmem:[%s5803_s10 + $0x38] sm:$0xff] }
0x18ed   :  { %v3363_v10 = vadd.f32 1e-12, %v3361_v8  ;;  %v4843_v7 = vpack.c.bf16 %v3710_v6, %v3709_v5  ;;  %v3711_v8 = vld [vmem:[%s5803_s10 + $0x40] sm:$0xff] }
0x18ee   :  { %4940 = vrsqrt.f32 %v3364_v9  ;;  %v3712_v9 = vld [vmem:[%s5803_s10 + $0x48] sm:$0xff] }
0x18ef   :  { %4942 = vrsqrt.f32 %v3363_v10  ;;  %v4849_v10 = vpack.c.bf16 %v3712_v9, %v3711_v8 }
0x18f8   :  { %v4941_v11 = vpop.eup %4940 }
0x18f9   :  { %v4943_v13 = vpop.eup %4942  ;;  %v3368_v14 = vmul.f32 %v4941_v11, %v3352_v52 }
0x18fa   :  { %v3367_v16 = vmul.f32 %v4943_v13, %v3351_v53 }
0x18fb   :  { %v3374_v17 = vmul.f32 %v4057_v12, %v3368_v14 }
0x18fc   :  { %v3373_v18 = vmul.f32 %v4057_v12, %v3367_v16 }
0x18fd   :  { %v3380_v19 = vadd.f32 %v4058_v15, %v3374_v17 }
0x18fe   :  { %v3379_v20 = vadd.f32 %v4058_v15, %v3373_v18 }
0x18ff   :  { %v3382_v21 = vrot.slane %v3380_v19, 7 }
0x1900   :  { %4607 = vmatprep.mubr.msk.f32.mxu0 %vm55_vm0, %v3379_v20 }
0x1901   :  { %4608 = vmatmul.mubr.msk.f32.vlgmr.msra.gmra.mrb[38].mxu0 %vm55_vm0, %v3380_v19  ;;  %v3385_v22 = vsel %vm3384_vm5, %v3379_v20, %v3382_v21  ;;  %v3713_v21 = vld [vmem:[%s5803_s10 + $0x50] sm:$0xff] }
0x1902   :  { %4586 = vmatmul.mubr.msk.f32.vlgmr.msra.gmra.mrb[30].mxu1 %vm55_vm0, %v3385_v22  ;;  %v3714_v22 = vld [vmem:[%s5803_s10 + $0x58] sm:$0xff] }
0x1903   :  { %4596 = vmatprep.mubr.msk.f32.mxu1 %vm5003_vm1, %v5002_v48  ;;  %4813 = vmatpush3.bf16.msra.mxu1 %v4812_v26  ;;  %v4067_v48 = vld [vmem:[%s5801_s8 + $0x3] ss:$0 sm:$0xff]  ;;  %v4855_v23 = vpack.c.bf16 %v3714_v22, %v3713_v21  ;;  %v4861_v26 = vpack.c.bf16 %v3716_v25, %v3715_v24 }
0x1904   :  { %4814 = vmatprep.subr.bf16.mxu1 %v5004_v62  ;;  %v4825_v62 = vpack.c.bf16 %v3704_v60, %v3703_v59 }
0x1907   :  { %4816 = vmatpush3.bf16.msra.mxu1 %v4815_v28  ;;  %v3718_v28 = vld [vmem:[%s5803_s10 + $0x78] sm:$0xff] }
0x1908   :  { %4827 = vmatprep.subr.msk.bf16.mxu1 %vm5675_vm6, %v4825_v62 }
0x19d4   :  { %v4609_v30 = vpop.f32.mrb[38].mxu0 }
0x19d5   :  { %v3642_v31 = vadd.f32 %v4609_v30, %v4067_v48  ;;  %v3464_v32 = vpop.f32.mrb[30].mxu1  ;;  %v3636_v33 = vpop.f32.mrb[39].mxu0 }
0x19d6   :  { %v3465_v37 = vadd.f32 %v4059_v29, %v3464_v32  ;;  %v3637_v38 = vadd.f32 %v4067_v48, %v3636_v33  ;;  %v4587_v39 = vpop.f32.mrb[31].mxu1  ;;  %v4867_v48 = vpack.c.bf16 %v3718_v28, %v3717_v27  ;;  %v4061_v29 = vld [vmem:[%s5806_s13] ss:$0 sm:$0xff] }
0x19d7   :  { %v3648_v41 = vmul.f32 0.044715, %v3642_v31  ;;  %v3646_v53 = vmul.f32 0.5, %v3642_v31 }
0x19d8   :  { %4944 = vtanh.f32 %v3465_v37  ;;  %v3647_v42 = vmul.f32 0.044715, %v3637_v38  ;;  %v3645_v40 = vmul.f32 0.5, %v3637_v38 }
0x19d9   :  { %v3650_v43 = vmul.f32 %v3648_v41, %v3642_v31 }
0x19da   :  { %v3649_v44 = vmul.f32 %v3647_v42, %v3637_v38 }
0x19db   :  { %v3652_v36 = vmul.f32 %v3650_v43, %v3642_v31 }
0x19dc   :  { %v3651_v34 = vmul.f32 %v3649_v44, %v3637_v38  ;;  %v4070_v44 = vld [vmem:[%s5801_s8 + $0x4] ss:$0 sm:$0xff] }
0x19dd   :  { %v3654_v45 = vadd.f32 %v3652_v36, %v3642_v31 }
0x19de   :  { %v3653_v46 = vadd.f32 %v3651_v34, %v3637_v38 }
0x19df   :  { %v3656_v47 = vmul.f32 0.7978846, %v3654_v45 }
0x19e0   :  { %v3655_v49 = vmul.f32 0.7978846, %v3653_v46  ;;  %v4071_v46 = vld [vmem:[%s5801_s8 + $0x5] ss:$0 sm:$0xff] }
0x19e1   :  { %4946 = vtanh.f32 %v3656_v47 }
0x19e2   :  { %v4945_v50 = vpop.eup %4944  ;;  %4948 = vtanh.f32 %v3655_v49 }
0x19e3   :  { %4597 = vmatmul.mubr.msk.f32.vlgmr.msra.gmra.mrb[32].mxu1 %vm55_vm0, %v4945_v50 }
0x19e4   :  { %4830 = vmatpush3.bf16.xpose.msk.msra.mxu1 %vm5675_vm6, %v4825_v62 }
0x19e5   :  { %4833 = vmatprep.subr.msk.bf16.mxu1 %vm5675_vm6, %v4831_v1 }
0x19eb   :  { %v4947_v51 = vpop.eup %4946 }
0x19ec   :  { %v4949_v52 = vpop.eup %4948  ;;  %v3660_v54 = vadd.f32 1.0, %v4947_v51  ;;  %4836 = vmatpush3.bf16.xpose.msk.msra.mxu1 %vm5675_vm6, %v4831_v1 }
0x19ed   :  { %v3659_v35 = vadd.f32 1.0, %v4949_v52  ;;  %4839 = vmatprep.subr.msk.bf16.mxu1 %vm5675_vm6, %v4837_v4 }
0x19ee   :  { %v3662_v55 = vmul.f32 %v3660_v54, %v3646_v53 }
0x19ef   :  { %v3661_v56 = vmul.f32 %v3659_v35, %v3645_v40 }
0x19f0   :  { %v3668_v57 = vsel %vm55_vm0, %v3662_v55, 0.0 }
0x19f1   :  { %3669 = vadd.xlane.f32.xlu1 %v3668_v57  ;;  %v3665_v58 = vsel %vm55_vm0, %v3661_v56, 0.0 }
0x19f2   :  { %3666 = vadd.xlane.f32.xlu0 %v3665_v58 }
0x19f4   :  { %4842 = vmatpush3.bf16.xpose.msk.msra.mxu1 %vm5675_vm6, %v4837_v4 }
0x19f5   :  { %4845 = vmatprep.subr.msk.bf16.mxu1 %vm5675_vm6, %v4843_v7 }
0x19fc   :  { %4848 = vmatpush3.bf16.xpose.msk.msra.mxu1 %vm5675_vm6, %v4843_v7 }
0x19fd   :  { %4851 = vmatprep.subr.msk.bf16.mxu1 %vm5675_vm6, %v4849_v10 }
0x1a04   :  { %4854 = vmatpush3.bf16.xpose.msk.msra.mxu1 %vm5675_vm6, %v4849_v10 }
0x1a05   :  { %4857 = vmatprep.subr.msk.bf16.mxu1 %vm5675_vm6, %v4855_v23 }
0x1a0c   :  { %4860 = vmatpush3.bf16.xpose.msk.msra.mxu1 %vm5675_vm6, %v4855_v23 }
0x1a0d   :  { %4863 = vmatprep.subr.msk.bf16.mxu1 %vm5675_vm6, %v4861_v26 }
0x1a14   :  { %4866 = vmatpush3.bf16.xpose.msk.msra.mxu1 %vm5675_vm6, %v4861_v26 }
0x1a15   :  { %4869 = vmatprep.subr.msk.bf16.mxu1 %vm5675_vm6, %v4867_v48 }
0x1a1c   :  { %4872 = vmatpush3.bf16.xpose.msk.msra.mxu1 %vm5675_vm6, %v4867_v48 }
0x1a7e   :  { %v3670_v11 = vpop.xlane.xlu1 %3669 }
0x1a7f   :  { %v3672_v12 = vmul.f32 0.03125, %v3670_v11  ;;  %v3667_v13 = vpop.xlane.xlu0 %3666 }
0x1a80   :  { %v3671_v14 = vmul.f32 0.03125, %v3667_v13 }
0x1a81   :  { %v3674_v15 = vsub.f32 %v3662_v55, %v3672_v12 }
0x1a82   :  { %v3673_v16 = vsub.f32 %v3661_v56, %v3671_v14 }
0x1a83   :  { %v3676_v17 = vmul.f32 %v3674_v15, %v3674_v15 }
0x1a84   :  { %v3675_v18 = vmul.f32 %v3673_v16, %v3673_v16 }
0x1a85   :  { %v3680_v19 = vsel %vm55_vm0, %v3676_v17, 0.0 }
0x1a86   :  { %3681 = vadd.xlane.f32.xlu1 %v3680_v19  ;;  %v3677_v20 = vsel %vm55_vm0, %v3675_v18, 0.0 }
0x1a87   :  { %3678 = vadd.xlane.f32.xlu0 %v3677_v20 }
0x1ab6   :  { %v3549_v30 = vpop.f32.mrb[32].mxu1 }
0x1ab7   :  { %v3550_v31 = vadd.f32 %v4061_v29, %v3549_v30  ;;  %v4598_v32 = vpop.f32.mrb[33].mxu1 }
0x1ab9   :  { %3554 = vst.msk [vmem:[#allocation4] sm:$0x3] %vm3553_vm7, %v3550_v31 }
0x1b13   :  { %v3682_v33 = vpop.xlane.xlu1 %3681 }
0x1b14   :  { %v3684_v37 = vmul.f32 0.03125, %v3682_v33  ;;  %v3679_v38 = vpop.xlane.xlu0 %3678 }
0x1b15   :  { %v3683_v39 = vmul.f32 0.03125, %v3679_v38 }
0x1b16   :  { %v3686_v41 = vadd.f32 1e-12, %v3684_v37 }
0x1b17   :  { %v3685_v42 = vadd.f32 1e-12, %v3683_v39 }
0x1b18   :  { %4950 = vrsqrt.f32 %v3686_v41 }
0x1b19   :  { %4952 = vrsqrt.f32 %v3685_v42 }
0x1b22   :  { %v4951_v43 = vpop.eup %4950 }
0x1b23   :  { %v4953_v36 = vpop.eup %4952  ;;  %v3690_v34 = vmul.f32 %v4951_v43, %v3674_v15 }
0x1b24   :  { %v3689_v45 = vmul.f32 %v4953_v36, %v3673_v16 }
0x1b25   :  { %v3696_v47 = vmul.f32 %v4070_v44, %v3690_v34 }
0x1b26   :  { %v3695_v49 = vmul.f32 %v4070_v44, %v3689_v45 }
0x1b27   :  { %v3702_v51 = vadd.f32 %v4071_v46, %v3696_v47 }
0x1b28   :  { %v3701_v50 = vadd.f32 %v4071_v46, %v3695_v49 }
0x1b2a   :  { %4642 = vmatprep.mubr.msk.f32.mxu1 %vm55_vm0, %v3701_v50 }
0x1b2b   :  { %4643 = vmatmul.mubr.msk.f32.vlgmr.msra.gmra.mrb[34].mxu1 %vm55_vm0, %v3702_v51 }
0x1b2c   :  { %4965 = shalt.err (!%p4962_p4)
}
0x1b2d   :  { %s4966_s7 = scalar_lea.hbm %s5808_s15, 32 }
0x1b2e   :  { %p4967_p5 = scmp.ne.s32.totalorder %s5808_s15, %s4966_s7  ;;  %p4970_p6 = scmp.lt.u32.totalorder %s4966_s7, %s5808_s15 }
0x1b30   :  { %p4972_p7 = pnand %p4970_p6, %p4967_p5 }
0x1b32   :  { %4975 = shalt.err (!%p4972_p7)
}
0x1b33   :  { %3878 = dma.vmem_to_hbm [thread:$0]  %s3876_s29, 32, %s5808_s15, [#allocation5]   ;;  %v4072_v52 = vld [vmem:[%s5804_s11] ss:$0 sm:$0xff] }
0x1b34   :  { %s5006_s21 = smov [#allocation2]  }
0x1b35   :  { %s3862_s12 = sshll.u32 %s5006_s21, 4  ;;  %s3863_s12 = int_to_ptr.vmem [resolvable:$true] %s3862_s12 }
0x1b36   :  { %s4976_s0 = scalar_lea.vmem %s3863_s12, 256  ;;  %p4981_p9 = scmp.lt.s32.totalorder %s3863_s12, %s3863_s12 }
0x1b37   :  { %p4977_p8 = scmp.ne.s32.totalorder %s3863_s12, %s4976_s0  ;;  %p4982_p10 = scmp.lt.s32.totalorder %s4976_s0, %s4976_s0 }
0x1b39   :  { %p4983_p11 = por %p4982_p10, %p4981_p9 }
0x1b3b   :  { %p4984_p12 = pnand %p4983_p11, %p4977_p8 }
0x1bfe   :  { %v4644_v53 = vpop.f32.mrb[34].mxu1 }
0x1bff   :  { %v3852_v54 = vadd.f32 %v4644_v53, %v4072_v52  ;;  %v3846_v40 = vpop.f32.mrb[35].mxu1 }
0x1c00   :  { %v3847_v35 = vadd.f32 %v4072_v52, %v3846_v40 }
0x1c01   :  { %3856 = vst [vmem:[#allocation2 + $0x8] sm:$0xff] %v3852_v54 }
0x1c02   :  { %3855 = vst [vmem:[#allocation2] sm:$0xff] %v3847_v35 }
0x1c03   :  { %4987 = shalt.err (!%p4984_p12)
}
0x1c04   :  { %s4988_s11 = scalar_lea.hbm %s5807_s14, 256 }
0x1c05   :  { %p4989_p13 = scmp.ne.s32.totalorder %s5807_s14, %s4988_s11  ;;  %p4992_p0 = scmp.lt.u32.totalorder %s4988_s11, %s5807_s14 }
0x1c07   :  { %p4994_p1 = pnand %p4992_p0, %p4989_p13 }
0x1c09   :  { %4997 = shalt.err (!%p4994_p1)
}
0x1c0a   :  { %s5007_s25 = smov 128   ;;  %s5008_s26 = smov 8  }
0x1c0b   :  { %3868 = dma.vmem_to_hbm [thread:$0]  %s3863_s12, 256, %s5807_s14, [#allocation3], %s5007_s25, %s5007_s25, %s5008_s26  }
0x1c0c   :  { %4998 = dma.done.wait [#allocation3], 256  }
0x1c0d   :  { %4999 = vsyncadd [#allocation3], 4294967040 }
0x1c0e   :  { %5000 = dma.done.wait [#allocation5], 32  }
0x1c0f   :  { %5001 = vsyncadd [#allocation5], 4294967264 }
0x1c10   :  { %3885 = vsyncpa [#allocation3], 1 }
0x1c11   :  { %3886 = vsyncpa [#allocation5], 1 }

</bundles_post_ra>
